<compile_context>
chip_gen: v7x
topology: tpu7x:2x2x1
jax: 0.10.0
libtpu: 0.0.40
codegen_flags: <defaults>
</compile_context>

<pallas_src>
import functools
import math

import jax
import jax.numpy as jnp
from jax.experimental import pallas as pl


# ------------------------------ in-kernel helpers ----------------------------

def _act(x, kind):
    if kind == "relu":
        return jnp.maximum(x, 0.0)
    if kind == "leaky":
        return jnp.where(x > 0, x, 0.01 * x)   # nn.LeakyReLU default slope
    return x


def _bn(h, eps):
    # Training-mode BatchNorm2d forward (batch stats, gamma=1, beta=0, biased var).
    # TODO(synk): running-mean/var buffer updates are training state, not forward math.
    mean = jnp.mean(h, axis=0, keepdims=True)
    var = jnp.mean((h - mean) ** 2, axis=0, keepdims=True)
    return (h - mean) * jax.lax.rsqrt(var + eps)


# ------------------------------ Pallas kernels -------------------------------

def _mm_bias_kernel(p_ref, w_ref, b_ref, o_ref, *, pre, post):
    """o = post_act( pre_act(P) @ W + b ).  Whole arrays in VMEM, one MXU pass."""
    a = _act(p_ref[...], pre)
    y = jnp.dot(a, w_ref[...], preferred_element_type=jnp.float32) + b_ref[...]
    o_ref[...] = _act(y, post)


def _res_block_kernel(p_ref, x_ref, w1_ref, w2_ref, o_ref, *, eps):
    """Whole Residual block fused:
       leaky -> conv3x3(no bias) -> BN -> leaky -> conv1x1(no bias) -> BN -> +skip.
       The skip is the *post-activation* input (PyTorch LeakyReLU(inplace=True))."""
    h1 = jnp.dot(_act(p_ref[...], "leaky"), w1_ref[...],
                 preferred_element_type=jnp.float32)
    h1 = _bn(h1, eps)
    h2 = jnp.dot(_act(h1, "leaky"), w2_ref[...],
                 preferred_element_type=jnp.float32)
    h2 = _bn(h2, eps)
    o_ref[...] = h2 + _act(x_ref[...], "leaky")


def _vq_kernel(h_ref, wp_ref, bp_ref, e_ref, q_ref, loss_ref, perp_ref, *,
               commitment_cost, num_embeddings):
    """Fused: residual-stack final ReLU + pre-VQ 1x1 conv + VectorQuantizer."""
    z = jnp.dot(jnp.maximum(h_ref[...], 0.0), wp_ref[...],
                preferred_element_type=jnp.float32) + bp_ref[...]        # (M, D)
    e = e_ref[...]                                                       # (K, D)
    M, D = z.shape

    z2 = jnp.sum(z * z, axis=1, keepdims=True)                           # (M, 1)
    ones_d = jnp.ones((1, D), jnp.float32)
    e2 = jax.lax.dot_general(ones_d, e * e, (((1,), (1,)), ((), ())),
                             preferred_element_type=jnp.float32)         # (1, K)
    ze = jax.lax.dot_general(z, e, (((1,), (1,)), ((), ())),
                             preferred_element_type=jnp.float32)         # (M, K)
    d = z2 - 2.0 * ze + e2                                               # sq dists

    col = jax.lax.broadcasted_iota(jnp.int32, d.shape, 1)
    min_d = jnp.min(d, axis=1, keepdims=True)
    idx = jnp.min(jnp.where(d <= min_d, col, num_embeddings),
                  axis=1, keepdims=True)                  # first argmin (M, 1)
    enc = (col == idx).astype(jnp.float32)                # one-hot (M, K)

    q = jnp.dot(enc, e, preferred_element_type=jnp.float32)              # (M, D)
    # TODO(synk): straight-through estimator (z + (q - z).detach()) is a
    # gradient-only construct; forward value equals q, which is what we emit.
    q_ref[...] = q

    diff = q - z
    mse = jnp.mean(diff * diff)
    # q_latent_loss + commitment_cost * e_latent_loss (identical forward values).
    loss_ref[...] = (mse * (1.0 + commitment_cost)).reshape(1, 1)

    ones_m = jnp.ones((1, M), jnp.float32)
    avg = jax.lax.dot_general(ones_m, enc, (((1,), (0,)), ((), ())),
                              preferred_element_type=jnp.float32) / M    # (1, K)
    perp_ref[...] = jnp.exp(-jnp.sum(avg * jnp.log(avg + 1e-10))).reshape(1, 1)


# ----------------------- XLA-side glue (im2col, weights) ---------------------

def _im2col(x, kh, kw, stride, padding):
    """NHWC x -> (B*OH*OW, kh*kw*C) patch matrix (column order: di, dj, c)."""
    B, H, W, C = x.shape
    xp = jnp.pad(x, ((0, 0), (padding, padding), (padding, padding), (0, 0)))
    OH = (H + 2 * padding - kh) // stride + 1
    OW = (W + 2 * padding - kw) // stride + 1
    cols = []
    for di in range(kh):
        for dj in range(kw):
            cols.append(xp[:, di:di + stride * OH:stride,
                            dj:dj + stride * OW:stride, :])
    p = jnp.concatenate(cols, axis=-1) if len(cols) > 1 else cols[0]
    return p.reshape(B * OH * OW, kh * kw * C), OH, OW


def _wmat(w):
    """Torch Conv2d weight (Cout, Cin, kh, kw) -> (kh*kw*Cin, Cout)."""
    Cout, Cin, kh, kw = w.shape
    return w.transpose(2, 3, 1, 0).reshape(kh * kw * Cin, Cout)


def _convT_weight_subpixel(w):
    """Torch ConvTranspose2d weight (Cin, Cout, 4, 4) with stride=2, pad=1 ->
    phase-packed matrix (9*Cin, 4*Cout) acting on 3x3/pad-1 patches of the
    input.  Output column block (ph*2+pw) holds output phase (2m+ph, 2n+pw)."""
    Cin, Cout = w.shape[0], w.shape[1]
    Wc = jnp.zeros((3, 3, Cin, 2, 2, Cout), w.dtype)
    for ph in range(2):
        for pw in range(2):
            for dh in range(2):
                for dw in range(2):
                    wi, wj = ph + dh, pw + dw
                    kh, kw = 3 - ph - 2 * dh, 3 - pw - 2 * dw
                    Wc = Wc.at[wi, wj, :, ph, pw, :].set(w[:, :, kh, kw])
    return Wc.reshape(9 * Cin, 4 * Cout)


# ----------------------------- fused layer wrappers ---------------------------

def pallas_conv(x, w, b, stride, padding, pre="none", post="none"):
    """Fused conv + bias + activation, NHWC in / NHWC out, one pallas_call."""
    Cout = w.shape[0]
    kh, kw = w.shape[2], w.shape[3]
    p, OH, OW = _im2col(x, kh, kw, stride, padding)
    bmat = (b if b is not None else jnp.zeros((Cout,), jnp.float32)).reshape(1, Cout)
    M = p.shape[0]
    out = pl.pallas_call(
        functools.partial(_mm_bias_kernel, pre=pre, post=post),
        out_shape=jax.ShapeDtypeStruct((M, Cout), jnp.float32),
    )(p, _wmat(w), bmat)
    return out.reshape(x.shape[0], OH, OW, Cout)


def pallas_residual_block(x, w1, w2, eps=1e-5):
    """One pallas_call per Residual block."""
    B, H, W, C = x.shape
    Ch = w2.shape[0]
    p, _, _ = _im2col(x, 3, 3, 1, 1)
    out = pl.pallas_call(
        functools.partial(_res_block_kernel, eps=eps),
        out_shape=jax.ShapeDtypeStruct((B * H * W, Ch), jnp.float32),
    )(p, x.reshape(B * H * W, C), _wmat(w1), _wmat(w2))
    return out.reshape(B, H, W, Ch)


def pallas_conv_transpose(x, w, b, pre="none", post="none"):
    """ConvTranspose2d(kernel=4, stride=2, padding=1) via sub-pixel phases."""
    B, H, W, Cin = x.shape
    Cout = w.shape[1]
    p, _, _ = _im2col(x, 3, 3, 1, 1)                  # (B*H*W, 9*Cin)
    Wc = _convT_weight_subpixel(w)                    # (9*Cin, 4*Cout)
    bc = jnp.tile(b, 4).reshape(1, 4 * Cout)          # phase-major bias
    M = p.shape[0]
    out = pl.pallas_call(
        functools.partial(_mm_bias_kernel, pre=pre, post=post),
        out_shape=jax.ShapeDtypeStruct((M, 4 * Cout), jnp.float32),
    )(p, Wc, bc)
    out = out.reshape(B, H, W, 2, 2, Cout)            # (..., ph, pw, Cout)
    out = out.transpose(0, 1, 3, 2, 4, 5).reshape(B, 2 * H, 2 * W, Cout)
    return out


# --------------------------------- model forward ------------------------------

def model_forward(x_nchw, P, commitment_cost):
    x = x_nchw.transpose(0, 2, 3, 1)                  # NCHW -> NHWC (C=1)

    # Encoder
    h = pallas_conv(x, P["enc_c1_w"], P["enc_c1_b"], 2, 1, post="relu")
    h = pallas_conv(h, P["enc_c2_w"], P["enc_c2_b"], 2, 1, post="relu")
    h = pallas_conv(h, P["enc_c3_w"], P["enc_c3_b"], 1, 1)
    for layer in P["enc_res"]:
        h = pallas_residual_block(h, layer["w1"], layer["w2"])
    # The residual stack's final ReLU is fused into the VQ kernel prologue.

    # pre-VQ 1x1 conv + VectorQuantizer (decay=0 branch) in one kernel.
    B, Hh, Ww, Ch = h.shape
    D = P["prevq_w"].shape[0]
    Ke = P["emb"].shape[0]
    h_flat = h.reshape(B * Hh * Ww, Ch)
    q_flat, loss, perp = pl.pallas_call(
        functools.partial(_vq_kernel, commitment_cost=commitment_cost,
                          num_embeddings=Ke),
        out_shape=(jax.ShapeDtypeStruct((B * Hh * Ww, D), jnp.float32),
                   jax.ShapeDtypeStruct((1, 1), jnp.float32),
                   jax.ShapeDtypeStruct((1, 1), jnp.float32)),
    )(h_flat, _wmat(P["prevq_w"]), P["prevq_b"].reshape(1, D), P["emb"])
    quantized = q_flat.reshape(B, Hh, Ww, D)          # already NHWC/flat order

    # Decoder
    d = pallas_conv(quantized, P["dec_c1_w"], P["dec_c1_b"], 1, 1)
    for layer in P["dec_res"]:
        d = pallas_residual_block(d, layer["w1"], layer["w2"])
    # pre="relu" fuses the decoder residual stack's final ReLU.
    d = pallas_conv_transpose(d, P["dec_t1_w"], P["dec_t1_b"],
                              pre="relu", post="relu")
    x_recon = pallas_conv_transpose(d, P["dec_t2_w"], P["dec_t2_b"])
    return loss[0, 0], x_recon.transpose(0, 3, 1, 2), perp[0, 0]


# ----------------------------- parameter init ---------------------------------

def _uniform(key, shape, bound):
    return jax.random.uniform(key, shape, jnp.float32, -bound, bound)


def init_params(key, num_hiddens, num_residual_layers, num_residual_hiddens,
                num_embeddings, embedding_dim):
    keys = iter(jax.random.split(key, 64))

    def conv_p(cout, cin, k, bias=True):
        bound = 1.0 / math.sqrt(cin * k * k)
        w = _uniform(next(keys), (cout, cin, k, k), bound)
        b = _uniform(next(keys), (cout,), bound) if bias else None
        return w, b

    def convT_p(cin, cout, k):
        bound = 1.0 / math.sqrt(cout * k * k)
        w = _uniform(next(keys), (cin, cout, k, k), bound)
        b = _uniform(next(keys), (cout,), bound)
        return w, b

    def res_stack(cin, hid, rhid, n):
        layers = []
        for _ in range(n):
            w1, _ = conv_p(rhid, cin, 3, bias=False)
            w2, _ = conv_p(hid, rhid, 1, bias=False)
            layers.append({"w1": w1, "w2": w2})
        return layers

    P = {}
    P["enc_c1_w"], P["enc_c1_b"] = conv_p(num_hiddens // 2, 1, 4)
    P["enc_c2_w"], P["enc_c2_b"] = conv_p(num_hiddens, num_hiddens // 2, 4)
    P["enc_c3_w"], P["enc_c3_b"] = conv_p(num_hiddens, num_hiddens, 3)
    P["enc_res"] = res_stack(num_hiddens, num_hiddens, num_residual_hiddens,
                             num_residual_layers)
    P["prevq_w"], P["prevq_b"] = conv_p(embedding_dim, num_hiddens, 1)
    P["emb"] = _uniform(next(keys), (num_embeddings, embedding_dim),
                        1.0 / num_embeddings)
    P["dec_c1_w"], P["dec_c1_b"] = conv_p(num_hiddens, embedding_dim, 3)
    P["dec_res"] = res_stack(num_hiddens, num_hiddens, num_residual_hiddens,
                             num_residual_layers)
    P["dec_t1_w"], P["dec_t1_b"] = convT_p(num_hiddens, num_hiddens // 2, 4)
    P["dec_t2_w"], P["dec_t2_b"] = convT_p(num_hiddens // 2, 1, 4)
    return P


# ---------------------------------- main ---------------------------------------

if __name__ == "__main__":
    num_hiddens = 32
    num_residual_layers = 2
    num_residual_hiddens = 8
    num_embeddings = 16
    embedding_dim = 8
    commitment_cost = 0.25

    key = jax.random.PRNGKey(0)
    kx, kp = jax.random.split(key)
    x = jax.random.normal(kx, (2, 1, 16, 16), jnp.float32)   # NCHW, 1 channel
    P = init_params(kp, num_hiddens, num_residual_layers, num_residual_hiddens,
                    num_embeddings, embedding_dim)

    fwd = jax.jit(functools.partial(model_forward,
                                    commitment_cost=commitment_cost))
    loss, x_recon, perplexity = fwd(x, P)
    jax.block_until_ready((loss, x_recon, perplexity))

    assert x_recon.shape == (2, 1, 16, 16)
    assert loss.shape == () and perplexity.shape == ()
    print("KERNEL_OK")
</pallas_src>

<mosaic_0001>
module attributes {stable_mosaic.version = 11 : i64} {
  func.func @_mm_bias_kernel(%arg0: memref<128x16xf32, #tpu.memory_space<vmem>>, %arg1: memref<16x16xf32, #tpu.memory_space<vmem>>, %arg2: memref<1x16xf32, #tpu.memory_space<vmem>>, %arg3: memref<128x16xf32, #tpu.memory_space<vmem>>) attributes {dimension_semantics = [], scalar_prefetch = 0 : i64, scratch_operands = 0 : i64, tpu.core_type = #tpu.core_type<tc>} {
    %c0 = arith.constant 0 : index
    %c0_0 = arith.constant 0 : index
    %0 = vector.load %arg0[%c0, %c0_0] : memref<128x16xf32, #tpu.memory_space<vmem>>, vector<128x16xf32>
    %c0_1 = arith.constant 0 : index
    %c0_2 = arith.constant 0 : index
    %1 = vector.load %arg1[%c0_1, %c0_2] : memref<16x16xf32, #tpu.memory_space<vmem>>, vector<16x16xf32>
    %cst = arith.constant dense<0.000000e+00> : vector<128x16xf32>
    %2 = tpu.matmul %0, %1, %cst {dimension_numbers = #tpu.dot_dimension_numbers<[1], [0], [0], [1], [0, 0, 1, 1], [], []>} : vector<128x16xf32>, vector<16x16xf32>, vector<128x16xf32> -> vector<128x16xf32>
    %c0_3 = arith.constant 0 : index
    %c0_4 = arith.constant 0 : index
    %3 = vector.load %arg2[%c0_3, %c0_4] : memref<1x16xf32, #tpu.memory_space<vmem>>, vector<1x16xf32>
    %4 = vector.broadcast %3 : vector<1x16xf32> to vector<128x16xf32>
    %5 = arith.addf %2, %4 : vector<128x16xf32>
    %cst_5 = arith.constant 0.000000e+00 : f32
    %6 = vector.broadcast %cst_5 : f32 to vector<128x16xf32>
    %7 = arith.maximumf %5, %6 : vector<128x16xf32>
    %c0_6 = arith.constant 0 : index
    %c0_7 = arith.constant 0 : index
    %8 = vector.load %arg3[%c0_6, %c0_7] : memref<128x16xf32, #tpu.memory_space<vmem>>, vector<128x16xf32>
    tpu.vector_store %arg3[%c0_6, %c0_7], %7 {strides = array<i32>} : memref<128x16xf32, #tpu.memory_space<vmem>>, vector<128x16xf32>,
    return
  }
}

module attributes {stable_mosaic.version = 11 : i64} {
  func.func @_mm_bias_kernel(%arg0: memref<32x256xf32, #tpu.memory_space<vmem>>, %arg1: memref<256x32xf32, #tpu.memory_space<vmem>>, %arg2: memref<1x32xf32, #tpu.memory_space<vmem>>, %arg3: memref<32x32xf32, #tpu.memory_space<vmem>>) attributes {dimension_semantics = [], scalar_prefetch = 0 : i64, scratch_operands = 0 : i64, tpu.core_type = #tpu.core_type<tc>} {
    %c0 = arith.constant 0 : index
    %c0_0 = arith.constant 0 : index
    %0 = vector.load %arg0[%c0, %c0_0] : memref<32x256xf32, #tpu.memory_space<vmem>>, vector<32x256xf32>
    %c0_1 = arith.constant 0 : index
    %c0_2 = arith.constant 0 : index
    %1 = vector.load %arg1[%c0_1, %c0_2] : memref<256x32xf32, #tpu.memory_space<vmem>>, vector<256x32xf32>
    %cst = arith.constant dense<0.000000e+00> : vector<32x32xf32>
    %2 = tpu.matmul %0, %1, %cst {dimension_numbers = #tpu.dot_dimension_numbers<[1], [0], [0], [1], [0, 0, 1, 1], [], []>} : vector<32x256xf32>, vector<256x32xf32>, vector<32x32xf32> -> vector<32x32xf32>
    %c0_3 = arith.constant 0 : index
    %c0_4 = arith.constant 0 : index
    %3 = vector.load %arg2[%c0_3, %c0_4] : memref<1x32xf32, #tpu.memory_space<vmem>>, vector<1x32xf32>
    %4 = vector.broadcast %3 : vector<1x32xf32> to vector<32x32xf32>
    %5 = arith.addf %2, %4 : vector<32x32xf32>
    %cst_5 = arith.constant 0.000000e+00 : f32
    %6 = vector.broadcast %cst_5 : f32 to vector<32x32xf32>
    %7 = arith.maximumf %5, %6 : vector<32x32xf32>
    %c0_6 = arith.constant 0 : index
    %c0_7 = arith.constant 0 : index
    %8 = vector.load %arg3[%c0_6, %c0_7] : memref<32x32xf32, #tpu.memory_space<vmem>>, vector<32x32xf32>
    tpu.vector_store %arg3[%c0_6, %c0_7], %7 {strides = array<i32>} : memref<32x32xf32, #tpu.memory_space<vmem>>, vector<32x32xf32>,
    return
  }
}

module attributes {stable_mosaic.version = 11 : i64} {
  func.func @_mm_bias_kernel(%arg0: memref<32x288xf32, #tpu.memory_space<vmem>>, %arg1: memref<288x32xf32, #tpu.memory_space<vmem>>, %arg2: memref<1x32xf32, #tpu.memory_space<vmem>>, %arg3: memref<32x32xf32, #tpu.memory_space<vmem>>) attributes {dimension_semantics = [], scalar_prefetch = 0 : i64, scratch_operands = 0 : i64, tpu.core_type = #tpu.core_type<tc>} {
    %c0 = arith.constant 0 : index
    %c0_0 = arith.constant 0 : index
    %0 = vector.load %arg0[%c0, %c0_0] : memref<32x288xf32, #tpu.memory_space<vmem>>, vector<32x288xf32>
    %c0_1 = arith.constant 0 : index
    %c0_2 = arith.constant 0 : index
    %1 = vector.load %arg1[%c0_1, %c0_2] : memref<288x32xf32, #tpu.memory_space<vmem>>, vector<288x32xf32>
    %cst = arith.constant dense<0.000000e+00> : vector<32x32xf32>
    %2 = tpu.matmul %0, %1, %cst {dimension_numbers = #tpu.dot_dimension_numbers<[1], [0], [0], [1], [0, 0, 1, 1], [], []>} : vector<32x288xf32>, vector<288x32xf32>, vector<32x32xf32> -> vector<32x32xf32>
    %c0_3 = arith.constant 0 : index
    %c0_4 = arith.constant 0 : index
    %3 = vector.load %arg2[%c0_3, %c0_4] : memref<1x32xf32, #tpu.memory_space<vmem>>, vector<1x32xf32>
    %4 = vector.broadcast %3 : vector<1x32xf32> to vector<32x32xf32>
    %5 = arith.addf %2, %4 : vector<32x32xf32>
    %c0_5 = arith.constant 0 : index
    %c0_6 = arith.constant 0 : index
    %6 = vector.load %arg3[%c0_5, %c0_6] : memref<32x32xf32, #tpu.memory_space<vmem>>, vector<32x32xf32>
    tpu.vector_store %arg3[%c0_5, %c0_6], %5 {strides = array<i32>} : memref<32x32xf32, #tpu.memory_space<vmem>>, vector<32x32xf32>,
    return
  }
}

module attributes {stable_mosaic.version = 11 : i64} {
  func.func @_res_block_kernel(%arg0: memref<32x288xf32, #tpu.memory_space<vmem>>, %arg1: memref<32x32xf32, #tpu.memory_space<vmem>>, %arg2: memref<288x8xf32, #tpu.memory_space<vmem>>, %arg3: memref<8x32xf32, #tpu.memory_space<vmem>>, %arg4: memref<32x32xf32, #tpu.memory_space<vmem>>) attributes {dimension_semantics = [], scalar_prefetch = 0 : i64, scratch_operands = 0 : i64, tpu.core_type = #tpu.core_type<tc>} {
    %c0 = arith.constant 0 : index
    %c0_0 = arith.constant 0 : index
    %0 = vector.load %arg0[%c0, %c0_0] : memref<32x288xf32, #tpu.memory_space<vmem>>, vector<32x288xf32>
    %cst = arith.constant 0.000000e+00 : f32
    %1 = vector.broadcast %cst : f32 to vector<32x288xf32>
    %2 = arith.cmpf ogt, %0, %1 : vector<32x288xf32>
    %cst_1 = arith.constant 0.00999999977 : f32
    %3 = vector.broadcast %cst_1 : f32 to vector<32x288xf32>
    %4 = arith.mulf %3, %0 : vector<32x288xf32>
    %5 = arith.select %2, %0, %4 : vector<32x288xi1>, vector<32x288xf32>
    %c0_2 = arith.constant 0 : index
    %c0_3 = arith.constant 0 : index
    %6 = vector.load %arg2[%c0_2, %c0_3] : memref<288x8xf32, #tpu.memory_space<vmem>>, vector<288x8xf32>
    %cst_4 = arith.constant dense<0.000000e+00> : vector<32x8xf32>
    %7 = tpu.matmul %5, %6, %cst_4 {dimension_numbers = #tpu.dot_dimension_numbers<[1], [0], [0], [1], [0, 0, 1, 1], [], []>} : vector<32x288xf32>, vector<288x8xf32>, vector<32x8xf32> -> vector<32x8xf32>
    %cst_5 = arith.constant dense<0.000000e+00> : vector<8xf32>
    %8 = vector.multi_reduction <add>, %7, %cst_5 [0] : vector<32x8xf32> to vector<8xf32>
    %9 = vector.shape_cast %8 : vector<8xf32> to vector<1x8xf32>
    %cst_6 = arith.constant 3.200000e+01 : f32
    %10 = vector.broadcast %cst_6 : f32 to vector<1x8xf32>
    %11 = arith.divf %9, %10 : vector<1x8xf32>
    %12 = vector.broadcast %11 : vector<1x8xf32> to vector<32x8xf32>
    %13 = arith.subf %7, %12 : vector<32x8xf32>
    %14 = arith.mulf %13, %13 : vector<32x8xf32>
    %cst_7 = arith.constant dense<0.000000e+00> : vector<8xf32>
    %15 = vector.multi_reduction <add>, %14, %cst_7 [0] : vector<32x8xf32> to vector<8xf32>
    %16 = vector.shape_cast %15 : vector<8xf32> to vector<1x8xf32>
    %cst_8 = arith.constant 3.200000e+01 : f32
    %17 = vector.broadcast %cst_8 : f32 to vector<1x8xf32>
    %18 = arith.divf %16, %17 : vector<1x8xf32>
    %19 = vector.broadcast %11 : vector<1x8xf32> to vector<32x8xf32>
    %20 = arith.subf %7, %19 : vector<32x8xf32>
    %cst_9 = arith.constant 9.99999974E-6 : f32
    %21 = vector.broadcast %cst_9 : f32 to vector<1x8xf32>
    %22 = arith.addf %18, %21 : vector<1x8xf32>
    %23 = math.rsqrt %22 : vector<1x8xf32>
    %24 = vector.broadcast %23 : vector<1x8xf32> to vector<32x8xf32>
    %25 = arith.mulf %20, %24 : vector<32x8xf32>
    %cst_10 = arith.constant 0.000000e+00 : f32
    %26 = vector.broadcast %cst_10 : f32 to vector<32x8xf32>
    %27 = arith.cmpf ogt, %25, %26 : vector<32x8xf32>
    %cst_11 = arith.constant 0.00999999977 : f32
    %28 = vector.broadcast %cst_11 : f32 to vector<32x8xf32>
    %29 = arith.mulf %28, %25 : vector<32x8xf32>
    %30 = arith.select %27, %25, %29 : vector<32x8xi1>, vector<32x8xf32>
    %c0_12 = arith.constant 0 : index
    %c0_13 = arith.constant 0 : index
    %31 = vector.load %arg3[%c0_12, %c0_13] : memref<8x32xf32, #tpu.memory_space<vmem>>, vector<8x32xf32>
    %cst_14 = arith.constant dense<0.000000e+00> : vector<32x32xf32>
    %32 = tpu.matmul %30, %31, %cst_14 {dimension_numbers = #tpu.dot_dimension_numbers<[1], [0], [0], [1], [0, 0, 1, 1], [], []>} : vector<32x8xf32>, vector<8x32xf32>, vector<32x32xf32> -> vector<32x32xf32>
    %cst_15 = arith.constant dense<0.000000e+00> : vector<32xf32>
    %33 = vector.multi_reduction <add>, %32, %cst_15 [0] : vector<32x32xf32> to vector<32xf32>
    %34 = vector.shape_cast %33 : vector<32xf32> to vector<1x32xf32>
    %cst_16 = arith.constant 3.200000e+01 : f32
    %35 = vector.broadcast %cst_16 : f32 to vector<1x32xf32>
    %36 = arith.divf %34, %35 : vector<1x32xf32>
    %37 = vector.broadcast %36 : vector<1x32xf32> to vector<32x32xf32>
    %38 = arith.subf %32, %37 : vector<32x32xf32>
    %39 = arith.mulf %38, %38 : vector<32x32xf32>
    %cst_17 = arith.constant dense<0.000000e+00> : vector<32xf32>
    %40 = vector.multi_reduction <add>, %39, %cst_17 [0] : vector<32x32xf32> to vector<32xf32>
    %41 = vector.shape_cast %40 : vector<32xf32> to vector<1x32xf32>
    %cst_18 = arith.constant 3.200000e+01 : f32
    %42 = vector.broadcast %cst_18 : f32 to vector<1x32xf32>
    %43 = arith.divf %41, %42 : vector<1x32xf32>
    %44 = vector.broadcast %36 : vector<1x32xf32> to vector<32x32xf32>
    %45 = arith.subf %32, %44 : vector<32x32xf32>
    %cst_19 = arith.constant 9.99999974E-6 : f32
    %46 = vector.broadcast %cst_19 : f32 to vector<1x32xf32>
    %47 = arith.addf %43, %46 : vector<1x32xf32>
    %48 = math.rsqrt %47 : vector<1x32xf32>
    %49 = vector.broadcast %48 : vector<1x32xf32> to vector<32x32xf32>
    %50 = arith.mulf %45, %49 : vector<32x32xf32>
    %c0_20 = arith.constant 0 : index
    %c0_21 = arith.constant 0 : index
    %51 = vector.load %arg1[%c0_20, %c0_21] : memref<32x32xf32, #tpu.memory_space<vmem>>, vector<32x32xf32>
    %cst_22 = arith.constant 0.000000e+00 : f32
    %52 = vector.broadcast %cst_22 : f32 to vector<32x32xf32>
    %53 = arith.cmpf ogt, %51, %52 : vector<32x32xf32>
    %cst_23 = arith.constant 0.00999999977 : f32
    %54 = vector.broadcast %cst_23 : f32 to vector<32x32xf32>
    %55 = arith.mulf %54, %51 : vector<32x32xf32>
    %56 = arith.select %53, %51, %55 : vector<32x32xi1>, vector<32x32xf32>
    %57 = arith.addf %50, %56 : vector<32x32xf32>
    %c0_24 = arith.constant 0 : index
    %c0_25 = arith.constant 0 : index
    %58 = vector.load %arg4[%c0_24, %c0_25] : memref<32x32xf32, #tpu.memory_space<vmem>>, vector<32x32xf32>
    tpu.vector_store %arg4[%c0_24, %c0_25], %57 {strides = array<i32>} : memref<32x32xf32, #tpu.memory_space<vmem>>, vector<32x32xf32>,
    return
  }
}

module attributes {stable_mosaic.version = 11 : i64} {
  func.func @_vq_kernel(%arg0: memref<32x32xf32, #tpu.memory_space<vmem>>, %arg1: memref<32x8xf32, #tpu.memory_space<vmem>>, %arg2: memref<1x8xf32, #tpu.memory_space<vmem>>, %arg3: memref<16x8xf32, #tpu.memory_space<vmem>>, %arg4: memref<32x8xf32, #tpu.memory_space<vmem>>, %arg5: memref<1x1xf32, #tpu.memory_space<vmem>>, %arg6: memref<1x1xf32, #tpu.memory_space<vmem>>) attributes {dimension_semantics = [], scalar_prefetch = 0 : i64, scratch_operands = 0 : i64, tpu.core_type = #tpu.core_type<tc>} {
    %c0 = arith.constant 0 : index
    %c0_0 = arith.constant 0 : index
    %0 = vector.load %arg0[%c0, %c0_0] : memref<32x32xf32, #tpu.memory_space<vmem>>, vector<32x32xf32>
    %cst = arith.constant 0.000000e+00 : f32
    %1 = vector.broadcast %cst : f32 to vector<32x32xf32>
    %2 = arith.maximumf %0, %1 : vector<32x32xf32>
    %c0_1 = arith.constant 0 : index
    %c0_2 = arith.constant 0 : index
    %3 = vector.load %arg1[%c0_1, %c0_2] : memref<32x8xf32, #tpu.memory_space<vmem>>, vector<32x8xf32>
    %cst_3 = arith.constant dense<0.000000e+00> : vector<32x8xf32>
    %4 = tpu.matmul %2, %3, %cst_3 {dimension_numbers = #tpu.dot_dimension_numbers<[1], [0], [0], [1], [0, 0, 1, 1], [], []>} : vector<32x32xf32>, vector<32x8xf32>, vector<32x8xf32> -> vector<32x8xf32>
    %c0_4 = arith.constant 0 : index
    %c0_5 = arith.constant 0 : index
    %5 = vector.load %arg2[%c0_4, %c0_5] : memref<1x8xf32, #tpu.memory_space<vmem>>, vector<1x8xf32>
    %6 = vector.broadcast %5 : vector<1x8xf32> to vector<32x8xf32>
    %7 = arith.addf %4, %6 : vector<32x8xf32>
    %c0_6 = arith.constant 0 : index
    %c0_7 = arith.constant 0 : index
    %8 = vector.load %arg3[%c0_6, %c0_7] : memref<16x8xf32, #tpu.memory_space<vmem>>, vector<16x8xf32>
    %9 = arith.mulf %7, %7 : vector<32x8xf32>
    %cst_8 = arith.constant dense<0.000000e+00> : vector<32xf32>
    %10 = vector.multi_reduction <add>, %9, %cst_8 [1] : vector<32x8xf32> to vector<32xf32>
    %11 = vector.shape_cast %10 : vector<32xf32> to vector<32x1xf32>
    %cst_9 = arith.constant 1.000000e+00 : f32
    %12 = vector.broadcast %cst_9 : f32 to vector<1x8xf32>
    %13 = arith.mulf %8, %8 : vector<16x8xf32>
    %cst_10 = arith.constant dense<0.000000e+00> : vector<1x16xf32>
    %14 = tpu.matmul %12, %13, %cst_10 {dimension_numbers = #tpu.dot_dimension_numbers<[1], [1], [0], [0], [0, 0, 1, 0], [], []>} : vector<1x8xf32>, vector<16x8xf32>, vector<1x16xf32> -> vector<1x16xf32>
    %cst_11 = arith.constant dense<0.000000e+00> : vector<32x16xf32>
    %15 = tpu.matmul %7, %8, %cst_11 {dimension_numbers = #tpu.dot_dimension_numbers<[1], [1], [0], [0], [0, 0, 1, 0], [], []>} : vector<32x8xf32>, vector<16x8xf32>, vector<32x16xf32> -> vector<32x16xf32>
    %cst_12 = arith.constant 2.000000e+00 : f32
    %16 = vector.broadcast %cst_12 : f32 to vector<32x16xf32>
    %17 = arith.mulf %16, %15 : vector<32x16xf32>
    %18 = vector.broadcast %11 : vector<32x1xf32> to vector<32x16xf32>
    %19 = arith.subf %18, %17 : vector<32x16xf32>
    %20 = vector.broadcast %14 : vector<1x16xf32> to vector<32x16xf32>
    %21 = arith.addf %19, %20 : vector<32x16xf32>
    %22 = tpu.iota {dimensions = array<i32: 1>} : vector<32x16xi32>
    %cst_13 = arith.constant dense<0x7F800000> : vector<32xf32>
    %23 = vector.multi_reduction <minimumf>, %21, %cst_13 [1] : vector<32x16xf32> to vector<32xf32>
    %24 = vector.shape_cast %23 : vector<32xf32> to vector<32x1xf32>
    %25 = vector.broadcast %24 : vector<32x1xf32> to vector<32x16xf32>
    %26 = arith.cmpf ole, %21, %25 : vector<32x16xf32>
    %c16_i32 = arith.constant 16 : i32
    %27 = vector.broadcast %c16_i32 : i32 to vector<32x16xi32>
    %28 = arith.select %26, %22, %27 : vector<32x16xi1>, vector<32x16xi32>
    %cst_14 = arith.constant dense<2147483647> : vector<32xi32>
    %29 = vector.multi_reduction <minsi>, %28, %cst_14 [1] : vector<32x16xi32> to vector<32xi32>
    %30 = vector.shape_cast %29 : vector<32xi32> to vector<32x1xi32>
    %31 = vector.broadcast %30 : vector<32x1xi32> to vector<32x16xi32>
    %32 = arith.cmpi eq, %22, %31 : vector<32x16xi32>
    %33 = arith.extui %32 : vector<32x16xi1> to vector<32x16xi32>
    %34 = arith.sitofp %33 : vector<32x16xi32> to vector<32x16xf32>
    %cst_15 = arith.constant dense<0.000000e+00> : vector<32x8xf32>
    %35 = tpu.matmul %34, %8, %cst_15 {dimension_numbers = #tpu.dot_dimension_numbers<[1], [0], [0], [1], [0, 0, 1, 1], [], []>} : vector<32x16xf32>, vector<16x8xf32>, vector<32x8xf32> -> vector<32x8xf32>
    %c0_16 = arith.constant 0 : index
    %c0_17 = arith.constant 0 : index
    %36 = vector.load %arg4[%c0_16, %c0_17] : memref<32x8xf32, #tpu.memory_space<vmem>>, vector<32x8xf32>
    tpu.vector_store %arg4[%c0_16, %c0_17], %35 {strides = array<i32>} : memref<32x8xf32, #tpu.memory_space<vmem>>, vector<32x8xf32>,
    %37 = arith.subf %35, %7 : vector<32x8xf32>
    %38 = arith.mulf %37, %37 : vector<32x8xf32>
    %39 = vector.shape_cast %38 : vector<32x8xf32> to vector<1x32x8xf32>
    %cst_18 = arith.constant dense<0.000000e+00> : vector<1xf32>
    %40 = vector.multi_reduction <add>, %39, %cst_18 [1, 2] : vector<1x32x8xf32> to vector<1xf32>
    %41 = vector.shape_cast %40 : vector<1xf32> to vector<1x1x1xf32>
    %42 = vector.extract %41[0, 0, 0] : f32 from vector<1x1x1xf32>
    %cst_19 = arith.constant 2.560000e+02 : f32
    %43 = arith.divf %42, %cst_19 : f32
    %cst_20 = arith.constant 1.250000e+00 : f32
    %44 = arith.mulf %43, %cst_20 : f32
    %45 = vector.broadcast %44 : f32 to vector<1x1xf32>
    %c0_21 = arith.constant 0 : index
    %c0_22 = arith.constant 0 : index
    %46 = vector.load %arg5[%c0_21, %c0_22] : memref<1x1xf32, #tpu.memory_space<vmem>>, vector<1x1xf32>
    tpu.vector_store %arg5[%c0_21, %c0_22], %45 {strides = array<i32>} : memref<1x1xf32, #tpu.memory_space<vmem>>, vector<1x1xf32>,
    %cst_23 = arith.constant 1.000000e+00 : f32
    %47 = vector.broadcast %cst_23 : f32 to vector<1x32xf32>
    %cst_24 = arith.constant dense<0.000000e+00> : vector<1x16xf32>
    %48 = tpu.matmul %47, %34, %cst_24 {dimension_numbers = #tpu.dot_dimension_numbers<[1], [0], [0], [1], [0, 0, 1, 1], [], []>} : vector<1x32xf32>, vector<32x16xf32>, vector<1x16xf32> -> vector<1x16xf32>
    %cst_25 = arith.constant 3.200000e+01 : f32
    %49 = vector.broadcast %cst_25 : f32 to vector<1x16xf32>
    %50 = arith.divf %48, %49 : vector<1x16xf32>
    %cst_26 = arith.constant 1.000000e-10 : f32
    %51 = vector.broadcast %cst_26 : f32 to vector<1x16xf32>
    %52 = arith.addf %50, %51 : vector<1x16xf32>
    %53 = math.log %52 : vector<1x16xf32>
    %54 = arith.mulf %50, %53 : vector<1x16xf32>
    %55 = vector.shape_cast %54 : vector<1x16xf32> to vector<1x1x16xf32>
    %cst_27 = arith.constant dense<0.000000e+00> : vector<1xf32>
    %56 = vector.multi_reduction <add>, %55, %cst_27 [1, 2] : vector<1x1x16xf32> to vector<1xf32>
    %57 = vector.shape_cast %56 : vector<1xf32> to vector<1x1x1xf32>
    %58 = vector.extract %57[0, 0, 0] : f32 from vector<1x1x1xf32>
    %cst_28 = arith.constant 0.000000e+00 : f32
    %59 = arith.subf %cst_28, %58 : f32
    %60 = math.exp %59 : f32
    %61 = vector.broadcast %60 : f32 to vector<1x1xf32>
    %c0_29 = arith.constant 0 : index
    %c0_30 = arith.constant 0 : index
    %62 = vector.load %arg6[%c0_29, %c0_30] : memref<1x1xf32, #tpu.memory_space<vmem>>, vector<1x1xf32>
    tpu.vector_store %arg6[%c0_29, %c0_30], %61 {strides = array<i32>} : memref<1x1xf32, #tpu.memory_space<vmem>>, vector<1x1xf32>,
    return
  }
}

module attributes {stable_mosaic.version = 11 : i64} {
  func.func @_mm_bias_kernel(%arg0: memref<32x72xf32, #tpu.memory_space<vmem>>, %arg1: memref<72x32xf32, #tpu.memory_space<vmem>>, %arg2: memref<1x32xf32, #tpu.memory_space<vmem>>, %arg3: memref<32x32xf32, #tpu.memory_space<vmem>>) attributes {dimension_semantics = [], scalar_prefetch = 0 : i64, scratch_operands = 0 : i64, tpu.core_type = #tpu.core_type<tc>} {
    %c0 = arith.constant 0 : index
    %c0_0 = arith.constant 0 : index
    %0 = vector.load %arg0[%c0, %c0_0] : memref<32x72xf32, #tpu.memory_space<vmem>>, vector<32x72xf32>
    %c0_1 = arith.constant 0 : index
    %c0_2 = arith.constant 0 : index
    %1 = vector.load %arg1[%c0_1, %c0_2] : memref<72x32xf32, #tpu.memory_space<vmem>>, vector<72x32xf32>
    %cst = arith.constant dense<0.000000e+00> : vector<32x32xf32>
    %2 = tpu.matmul %0, %1, %cst {dimension_numbers = #tpu.dot_dimension_numbers<[1], [0], [0], [1], [0, 0, 1, 1], [], []>} : vector<32x72xf32>, vector<72x32xf32>, vector<32x32xf32> -> vector<32x32xf32>
    %c0_3 = arith.constant 0 : index
    %c0_4 = arith.constant 0 : index
    %3 = vector.load %arg2[%c0_3, %c0_4] : memref<1x32xf32, #tpu.memory_space<vmem>>, vector<1x32xf32>
    %4 = vector.broadcast %3 : vector<1x32xf32> to vector<32x32xf32>
    %5 = arith.addf %2, %4 : vector<32x32xf32>
    %c0_5 = arith.constant 0 : index
    %c0_6 = arith.constant 0 : index
    %6 = vector.load %arg3[%c0_5, %c0_6] : memref<32x32xf32, #tpu.memory_space<vmem>>, vector<32x32xf32>
    tpu.vector_store %arg3[%c0_5, %c0_6], %5 {strides = array<i32>} : memref<32x32xf32, #tpu.memory_space<vmem>>, vector<32x32xf32>,
    return
  }
}

module attributes {stable_mosaic.version = 11 : i64} {
  func.func @_mm_bias_kernel(%arg0: memref<32x288xf32, #tpu.memory_space<vmem>>, %arg1: memref<288x64xf32, #tpu.memory_space<vmem>>, %arg2: memref<1x64xf32, #tpu.memory_space<vmem>>, %arg3: memref<32x64xf32, #tpu.memory_space<vmem>>) attributes {dimension_semantics = [], scalar_prefetch = 0 : i64, scratch_operands = 0 : i64, tpu.core_type = #tpu.core_type<tc>} {
    %c0 = arith.constant 0 : index
    %c0_0 = arith.constant 0 : index
    %0 = vector.load %arg0[%c0, %c0_0] : memref<32x288xf32, #tpu.memory_space<vmem>>, vector<32x288xf32>
    %cst = arith.constant 0.000000e+00 : f32
    %1 = vector.broadcast %cst : f32 to vector<32x288xf32>
    %2 = arith.maximumf %0, %1 : vector<32x288xf32>
    %c0_1 = arith.constant 0 : index
    %c0_2 = arith.constant 0 : index
    %3 = vector.load %arg1[%c0_1, %c0_2] : memref<288x64xf32, #tpu.memory_space<vmem>>, vector<288x64xf32>
    %cst_3 = arith.constant dense<0.000000e+00> : vector<32x64xf32>
    %4 = tpu.matmul %2, %3, %cst_3 {dimension_numbers = #tpu.dot_dimension_numbers<[1], [0], [0], [1], [0, 0, 1, 1], [], []>} : vector<32x288xf32>, vector<288x64xf32>, vector<32x64xf32> -> vector<32x64xf32>
    %c0_4 = arith.constant 0 : index
    %c0_5 = arith.constant 0 : index
    %5 = vector.load %arg2[%c0_4, %c0_5] : memref<1x64xf32, #tpu.memory_space<vmem>>, vector<1x64xf32>
    %6 = vector.broadcast %5 : vector<1x64xf32> to vector<32x64xf32>
    %7 = arith.addf %4, %6 : vector<32x64xf32>
    %cst_6 = arith.constant 0.000000e+00 : f32
    %8 = vector.broadcast %cst_6 : f32 to vector<32x64xf32>
    %9 = arith.maximumf %7, %8 : vector<32x64xf32>
    %c0_7 = arith.constant 0 : index
    %c0_8 = arith.constant 0 : index
    %10 = vector.load %arg3[%c0_7, %c0_8] : memref<32x64xf32, #tpu.memory_space<vmem>>, vector<32x64xf32>
    tpu.vector_store %arg3[%c0_7, %c0_8], %9 {strides = array<i32>} : memref<32x64xf32, #tpu.memory_space<vmem>>, vector<32x64xf32>,
    return
  }
}

module attributes {stable_mosaic.version = 11 : i64} {
  func.func @_mm_bias_kernel(%arg0: memref<128x144xf32, #tpu.memory_space<vmem>>, %arg1: memref<144x4xf32, #tpu.memory_space<vmem>>, %arg2: memref<1x4xf32, #tpu.memory_space<vmem>>, %arg3: memref<128x4xf32, #tpu.memory_space<vmem>>) attributes {dimension_semantics = [], scalar_prefetch = 0 : i64, scratch_operands = 0 : i64, tpu.core_type = #tpu.core_type<tc>} {
    %c0 = arith.constant 0 : index
    %c0_0 = arith.constant 0 : index
    %0 = vector.load %arg0[%c0, %c0_0] : memref<128x144xf32, #tpu.memory_space<vmem>>, vector<128x144xf32>
    %c0_1 = arith.constant 0 : index
    %c0_2 = arith.constant 0 : index
    %1 = vector.load %arg1[%c0_1, %c0_2] : memref<144x4xf32, #tpu.memory_space<vmem>>, vector<144x4xf32>
    %cst = arith.constant dense<0.000000e+00> : vector<128x4xf32>
    %2 = tpu.matmul %0, %1, %cst {dimension_numbers = #tpu.dot_dimension_numbers<[1], [0], [0], [1], [0, 0, 1, 1], [], []>} : vector<128x144xf32>, vector<144x4xf32>, vector<128x4xf32> -> vector<128x4xf32>
    %c0_3 = arith.constant 0 : index
    %c0_4 = arith.constant 0 : index
    %3 = vector.load %arg2[%c0_3, %c0_4] : memref<1x4xf32, #tpu.memory_space<vmem>>, vector<1x4xf32>
    %4 = vector.broadcast %3 : vector<1x4xf32> to vector<128x4xf32>
    %5 = arith.addf %2, %4 : vector<128x4xf32>
    %c0_5 = arith.constant 0 : index
    %c0_6 = arith.constant 0 : index
    %6 = vector.load %arg3[%c0_5, %c0_6] : memref<128x4xf32, #tpu.memory_space<vmem>>, vector<128x4xf32>
    tpu.vector_store %arg3[%c0_5, %c0_6], %5 {strides = array<i32>} : memref<128x4xf32, #tpu.memory_space<vmem>>, vector<128x4xf32>,
    return
  }
}

</mosaic_0001>

<bundles_post_ra>
// kernel: model_forward.11
= control target key start
LH: loop header
LB: loop body
LE: loop exit
PB: predicated region body
PF: predicated region fallthrough
CT: control target
= control target key end

     0   :  { %vm39_vm0 = vcmask 130048   ;;  %s495_s1 = inlined_call_operand.vmem [shape: f32[16,16], index: 1, kind: input, shape index: {}]   ;;  %s496_s0 = inlined_call_operand.vmem [shape: f32[128,16], index: 0, kind: input, shape index: {}]   ;;  %s497_s2 = inlined_call_operand.vmem [shape: f32[1,16], index: 2, kind: input, shape index: {}]   ;;  %s498_s3 = inlined_call_operand.vmem [shape: f32[128,16], index: 3, kind: output, shape index: {}]  }
   0x1   :  { %v30_v0 = vld [vmem:[%s495_s1] sm:$0xff]  ;;  %v31_v1 = vld [vmem:[%s495_s1 + $0x8] sm:$0xff]  ;;  %v16_v7 = vld [vmem:[%s496_s0 + $0x10] sm:$0xff] }
   0x2   :  { %v14_v2 = vld [vmem:[%s496_s0] sm:$0xff]  ;;  %v332_v3 = vpack.c.bf16 %v31_v1, %v30_v0  ;;  %v15_v5 = vld [vmem:[%s496_s0 + $0x8] sm:$0xff]  ;;  %v24_v8 = vld [vmem:[%s496_s0 + $0x50] sm:$0xff] }
   0x3   :  { %308 = vmatprep.mubr.msk.f32.mxu0 %vm39_vm0, %v14_v2  ;;  %v22_v4 = vld [vmem:[%s496_s0 + $0x40] sm:$0xff]  ;;  %v23_v6 = vld [vmem:[%s496_s0 + $0x48] sm:$0xff]  ;;  %v17_v9 = vld [vmem:[%s496_s0 + $0x18] sm:$0xff] }
   0x4   :  { %320 = vmatprep.mubr.msk.f32.mxu1 %vm39_vm0, %v22_v4  ;;  %333 = vmatprep.subr.bf16.mxu0 %v332_v3  ;;  %v25_v10 = vld [vmem:[%s496_s0 + $0x58] sm:$0xff]  ;;  %v18_v11 = vld [vmem:[%s496_s0 + $0x20] sm:$0xff]  ;;  %v19_v13 = vld [vmem:[%s496_s0 + $0x28] sm:$0xff] }
   0x5   :  { %336 = vmatprep.subr.bf16.mxu1 %v332_v3  ;;  %335 = vmatpush3.bf16.msra.mxu0 %v332_v3  ;;  %v26_v12 = vld [vmem:[%s496_s0 + $0x60] sm:$0xff]  ;;  %v27_v14 = vld [vmem:[%s496_s0 + $0x68] sm:$0xff]  ;;  %v20_v15 = vld [vmem:[%s496_s0 + $0x30] sm:$0xff] }
   0x6   :  { %337 = vmatpush3.bf16.msra.mxu1 %v332_v3  ;;  %v28_v16 = vld [vmem:[%s496_s0 + $0x70] sm:$0xff]  ;;  %v21_v17 = vld [vmem:[%s496_s0 + $0x38] sm:$0xff]  ;;  %v269_v19 = vld [vmem:[%s497_s2] ss:$0 sm:$0xff] }
   0x7   :  { %v29_v18 = vld [vmem:[%s496_s0 + $0x78] sm:$0xff] }
   0x8   :  { %309 = vmatmul.mubr.msk.f32.vlgmr.msra.gmra.mrb[0].mxu0 %vm39_vm0, %v15_v5 }
   0x9   :  { %321 = vmatmul.mubr.msk.f32.vlgmr.msra.gmra.mrb[0].mxu1 %vm39_vm0, %v23_v6  ;;  %311 = vmatprep.mubr.msk.f32.mxu0 %vm39_vm0, %v16_v7 }
   0xa   :  { %323 = vmatprep.mubr.msk.f32.mxu1 %vm39_vm0, %v24_v8 }
   0xc   :  { %312 = vmatmul.mubr.msk.f32.gmra.mrb[2].mxu0 %vm39_vm0, %v17_v9 }
   0xd   :  { %324 = vmatmul.mubr.msk.f32.gmra.mrb[2].mxu1 %vm39_vm0, %v25_v10  ;;  %314 = vmatprep.mubr.msk.f32.mxu0 %vm39_vm0, %v18_v11 }
   0xe   :  { %326 = vmatprep.mubr.msk.f32.mxu1 %vm39_vm0, %v26_v12 }
  0x10   :  { %315 = vmatmul.mubr.msk.f32.gmra.mrb[4].mxu0 %vm39_vm0, %v19_v13 }
  0x11   :  { %327 = vmatmul.mubr.msk.f32.gmra.mrb[4].mxu1 %vm39_vm0, %v27_v14  ;;  %317 = vmatprep.mubr.msk.f32.mxu0 %vm39_vm0, %v20_v15 }
  0x12   :  { %329 = vmatprep.mubr.msk.f32.mxu1 %vm39_vm0, %v28_v16 }
  0x14   :  { %318 = vmatmul.mubr.msk.f32.gmra.mrb[6].mxu0 %vm39_vm0, %v21_v17 }
  0x15   :  { %330 = vmatmul.mubr.msk.f32.gmra.mrb[6].mxu1 %vm39_vm0, %v29_v18 }
  0xdb   :  { %v310_v20 = vpop.f32.mrb[0].mxu0 }
  0xdc   :  { %v322_v21 = vpop.f32.mrb[0].mxu1  ;;  %v160_v22 = vadd.f32 %v310_v20, %v269_v19  ;;  %v154_v24 = vpop.f32.mrb[1].mxu0 }
  0xdd   :  { %v200_v23 = vadd.f32 %v322_v21, %v269_v19  ;;  %v194_v25 = vpop.f32.mrb[1].mxu1  ;;  %v155_v26 = vadd.f32 %v269_v19, %v154_v24 }
  0xde   :  { %v195_v27 = vadd.f32 %v269_v19, %v194_v25  ;;  %v234_v28 = vmax.f32 %v160_v22, 0.0 }
  0xdf   :  { %v242_v29 = vmax.f32 %v200_v23, 0.0  ;;  %v233_v30 = vmax.f32 %v155_v26, 0.0  ;;  %v313_v32 = vpop.f32.mrb[2].mxu0 }
  0xe0   :  { %v241_v31 = vmax.f32 %v195_v27, 0.0  ;;  %v325_v33 = vpop.f32.mrb[2].mxu1  ;;  %250 = vst.msk [vmem:[%s498_s3 + $0x8] sm:$0xff] %vm39_vm0, %v234_v28  ;;  %v170_v34 = vadd.f32 %v313_v32, %v269_v19  ;;  %v164_v36 = vpop.f32.mrb[3].mxu0 }
  0xe1   :  { %258 = vst.msk [vmem:[%s498_s3 + $0x48] sm:$0xff] %vm39_vm0, %v242_v29  ;;  %v210_v35 = vadd.f32 %v325_v33, %v269_v19  ;;  %v204_v37 = vpop.f32.mrb[3].mxu1  ;;  %249 = vst.msk [vmem:[%s498_s3] sm:$0xff] %vm39_vm0, %v233_v30  ;;  %v165_v38 = vadd.f32 %v269_v19, %v164_v36 }
  0xe2   :  { %257 = vst.msk [vmem:[%s498_s3 + $0x40] sm:$0xff] %vm39_vm0, %v241_v31  ;;  %v205_v39 = vadd.f32 %v269_v19, %v204_v37  ;;  %v236_v40 = vmax.f32 %v170_v34, 0.0 }
  0xe3   :  { %v244_v41 = vmax.f32 %v210_v35, 0.0  ;;  %v235_v42 = vmax.f32 %v165_v38, 0.0  ;;  %v316_v44 = vpop.f32.mrb[4].mxu0 }
  0xe4   :  { %v243_v43 = vmax.f32 %v205_v39, 0.0  ;;  %v328_v45 = vpop.f32.mrb[4].mxu1  ;;  %252 = vst.msk [vmem:[%s498_s3 + $0x18] sm:$0xff] %vm39_vm0, %v236_v40  ;;  %v180_v46 = vadd.f32 %v316_v44, %v269_v19  ;;  %v174_v48 = vpop.f32.mrb[5].mxu0 }
  0xe5   :  { %260 = vst.msk [vmem:[%s498_s3 + $0x58] sm:$0xff] %vm39_vm0, %v244_v41  ;;  %v220_v47 = vadd.f32 %v328_v45, %v269_v19  ;;  %v214_v49 = vpop.f32.mrb[5].mxu1  ;;  %251 = vst.msk [vmem:[%s498_s3 + $0x10] sm:$0xff] %vm39_vm0, %v235_v42  ;;  %v175_v50 = vadd.f32 %v269_v19, %v174_v48 }
  0xe6   :  { %259 = vst.msk [vmem:[%s498_s3 + $0x50] sm:$0xff] %vm39_vm0, %v243_v43  ;;  %v215_v51 = vadd.f32 %v269_v19, %v214_v49  ;;  %v238_v52 = vmax.f32 %v180_v46, 0.0 }
  0xe7   :  { %v246_v53 = vmax.f32 %v220_v47, 0.0  ;;  %v237_v54 = vmax.f32 %v175_v50, 0.0  ;;  %v319_v56 = vpop.f32.mrb[6].mxu0 }
  0xe8   :  { %v245_v55 = vmax.f32 %v215_v51, 0.0  ;;  %v331_v57 = vpop.f32.mrb[6].mxu1  ;;  %254 = vst.msk [vmem:[%s498_s3 + $0x28] sm:$0xff] %vm39_vm0, %v238_v52  ;;  %v190_v58 = vadd.f32 %v319_v56, %v269_v19  ;;  %v184_v60 = vpop.f32.mrb[7].mxu0 }
  0xe9   :  { %262 = vst.msk [vmem:[%s498_s3 + $0x68] sm:$0xff] %vm39_vm0, %v246_v53  ;;  %v230_v59 = vadd.f32 %v331_v57, %v269_v19  ;;  %v224_v61 = vpop.f32.mrb[7].mxu1  ;;  %253 = vst.msk [vmem:[%s498_s3 + $0x20] sm:$0xff] %vm39_vm0, %v237_v54  ;;  %v185_v62 = vadd.f32 %v269_v19, %v184_v60 }
  0xea   :  { %261 = vst.msk [vmem:[%s498_s3 + $0x60] sm:$0xff] %vm39_vm0, %v245_v55  ;;  %v225_v63 = vadd.f32 %v269_v19, %v224_v61  ;;  %v240_v0 = vmax.f32 %v190_v58, 0.0 }
  0xeb   :  { %v248_v1 = vmax.f32 %v230_v59, 0.0  ;;  %v239_v2 = vmax.f32 %v185_v62, 0.0 }
  0xec   :  { %v247_v3 = vmax.f32 %v225_v63, 0.0  ;;  %256 = vst.msk [vmem:[%s498_s3 + $0x38] sm:$0xff] %vm39_vm0, %v240_v0 }
  0xed   :  { %264 = vst.msk [vmem:[%s498_s3 + $0x78] sm:$0xff] %vm39_vm0, %v248_v1  ;;  %255 = vst.msk [vmem:[%s498_s3 + $0x30] sm:$0xff] %vm39_vm0, %v239_v2 }
  0xee   :  { %263 = vst.msk [vmem:[%s498_s3 + $0x70] sm:$0xff] %vm39_vm0, %v247_v3 }

// kernel: model_forward.12
= control target key start
LH: loop header
LB: loop body
LE: loop exit
PB: predicated region body
PF: predicated region fallthrough
CT: control target
= control target key end

     0   :  { %vm150_vm0 = vcmask 261120   ;;  %s407_s1 = inlined_call_operand.vmem [shape: f32[256,32], index: 1, kind: input, shape index: {}]   ;;  %s408_s0 = inlined_call_operand.vmem [shape: f32[32,256], index: 0, kind: input, shape index: {}]   ;;  %s409_s2 = inlined_call_operand.vmem [shape: f32[1,32], index: 2, kind: input, shape index: {}]   ;;  %s410_s3 = inlined_call_operand.vmem [shape: f32[32,32], index: 3, kind: output, shape index: {}]  }
   0x1   :  { %v38_v0 = vld [vmem:[%s407_s1 + $0x80] sm:$0xff]  ;;  %v39_v1 = vld [vmem:[%s407_s1 + $0x88] sm:$0xff]  ;;  %v40_v5 = vld [vmem:[%s407_s1 + $0x90] sm:$0xff] }
   0x2   :  { %v22_v2 = vld [vmem:[%s407_s1] sm:$0xff]  ;;  %v204_v3 = vpack.c.bf16 %v39_v1, %v38_v0  ;;  %v23_v4 = vld [vmem:[%s407_s1 + $0x8] sm:$0xff]  ;;  %v41_v6 = vld [vmem:[%s407_s1 + $0x98] sm:$0xff] }
   0x3   :  { %v206_v7 = vpack.c.bf16 %v23_v4, %v22_v2  ;;  %v208_v8 = vpack.c.bf16 %v41_v6, %v40_v5  ;;  %v24_v9 = vld [vmem:[%s407_s1 + $0x10] sm:$0xff]  ;;  %v25_v10 = vld [vmem:[%s407_s1 + $0x18] sm:$0xff]  ;;  %v42_v11 = vld [vmem:[%s407_s1 + $0xa0] sm:$0xff] }
   0x4   :  { %205 = vmatprep.subr.bf16.mxu0 %v204_v3  ;;  %236 = vmatprep.subr.bf16.mxu1 %v204_v3  ;;  %v43_v12 = vld [vmem:[%s407_s1 + $0xa8] sm:$0xff]  ;;  %v210_v13 = vpack.c.bf16 %v25_v10, %v24_v9  ;;  %v26_v15 = vld [vmem:[%s407_s1 + $0x20] sm:$0xff]  ;;  %v44_v17 = vld [vmem:[%s407_s1 + $0xb0] sm:$0xff] }
   0x5   :  { %207 = vmatpush3.bf16.msra.mxu0 %v206_v7  ;;  %244 = vmatpush3.bf16.msra.mxu1 %v206_v7  ;;  %v212_v14 = vpack.c.bf16 %v43_v12, %v42_v11  ;;  %v27_v16 = vld [vmem:[%s407_s1 + $0x28] sm:$0xff]  ;;  %v45_v18 = vld [vmem:[%s407_s1 + $0xb8] sm:$0xff]  ;;  %v28_v21 = vld [vmem:[%s407_s1 + $0x30] sm:$0xff] }
   0x6   :  { %209 = vmatprep.subr.bf16.mxu0 %v208_v8  ;;  %237 = vmatprep.subr.bf16.mxu1 %v208_v8  ;;  %v214_v19 = vpack.c.bf16 %v27_v16, %v26_v15  ;;  %v216_v20 = vpack.c.bf16 %v45_v18, %v44_v17  ;;  %v29_v22 = vld [vmem:[%s407_s1 + $0x38] sm:$0xff]  ;;  %v46_v23 = vld [vmem:[%s407_s1 + $0xc0] sm:$0xff]  ;;  %v47_v24 = vld [vmem:[%s407_s1 + $0xc8] sm:$0xff] }
   0x7   :  { %v15_v25 = vld [vmem:[%s408_s0 + $0x8] sm:$0xff]  ;;  %v218_v27 = vpack.c.bf16 %v29_v22, %v28_v21  ;;  %v220_v28 = vpack.c.bf16 %v47_v24, %v46_v23  ;;  %v30_v29 = vld [vmem:[%s407_s1 + $0x40] sm:$0xff]  ;;  %v48_v31 = vld [vmem:[%s407_s1 + $0xd0] sm:$0xff] }
   0x8   :  { %125 = vmatprep.mubr.f32.mxu0 %v15_v25  ;;  %v19_v26 = vld [vmem:[%s408_s0 + $0x28] sm:$0xff]  ;;  %v49_v32 = vld [vmem:[%s407_s1 + $0xd8] sm:$0xff]  ;;  %v32_v35 = vld [vmem:[%s407_s1 + $0x50] sm:$0xff] }
   0x9   :  { %211 = vmatpush3.bf16.msra.mxu0 %v210_v13  ;;  %245 = vmatpush3.bf16.msra.mxu1 %v210_v13  ;;  %v31_v30 = vld [vmem:[%s407_s1 + $0x48] sm:$0xff]  ;;  %v224_v34 = vpack.c.bf16 %v49_v32, %v48_v31  ;;  %v33_v36 = vld [vmem:[%s407_s1 + $0x58] sm:$0xff]  ;;  %v50_v37 = vld [vmem:[%s407_s1 + $0xe0] sm:$0xff] }
   0xa   :  { %213 = vmatprep.subr.bf16.mxu0 %v212_v14  ;;  %238 = vmatprep.subr.bf16.mxu1 %v212_v14  ;;  %v222_v33 = vpack.c.bf16 %v31_v30, %v30_v29  ;;  %v51_v38 = vld [vmem:[%s407_s1 + $0xe8] sm:$0xff]  ;;  %v226_v39 = vpack.c.bf16 %v33_v36, %v32_v35  ;;  %v34_v41 = vld [vmem:[%s407_s1 + $0x60] sm:$0xff]  ;;  %v52_v43 = vld [vmem:[%s407_s1 + $0xf0] sm:$0xff] }
   0xb   :  { %135 = vmatprep.mubr.f32.mxu1 %v19_v26  ;;  %v228_v40 = vpack.c.bf16 %v51_v38, %v50_v37  ;;  %v35_v42 = vld [vmem:[%s407_s1 + $0x68] sm:$0xff]  ;;  %v53_v44 = vld [vmem:[%s407_s1 + $0xf8] sm:$0xff]  ;;  %v36_v47 = vld [vmem:[%s407_s1 + $0x70] sm:$0xff] }
   0xc   :  { %v230_v45 = vpack.c.bf16 %v35_v42, %v34_v41  ;;  %v232_v46 = vpack.c.bf16 %v53_v44, %v52_v43  ;;  %v37_v48 = vld [vmem:[%s407_s1 + $0x78] sm:$0xff]  ;;  %v14_v50 = vld [vmem:[%s408_s0] sm:$0xff]  ;;  %v16_v54 = vld [vmem:[%s408_s0 + $0x10] sm:$0xff] }
   0xd   :  { %215 = vmatpush3.bf16.msra.mxu0 %v214_v19  ;;  %246 = vmatpush3.bf16.msra.mxu1 %v214_v19  ;;  %v234_v49 = vpack.c.bf16 %v37_v48, %v36_v47  ;;  %v18_v51 = vld [vmem:[%s408_s0 + $0x20] sm:$0xff]  ;;  %v17_v52 = vld [vmem:[%s408_s0 + $0x18] sm:$0xff]  ;;  %v20_v55 = vld [vmem:[%s408_s0 + $0x30] sm:$0xff] }
   0xe   :  { %217 = vmatprep.subr.bf16.mxu0 %v216_v20  ;;  %239 = vmatprep.subr.bf16.mxu1 %v216_v20  ;;  %v21_v53 = vld [vmem:[%s408_s0 + $0x38] sm:$0xff]  ;;  %v159_v58 = vld [vmem:[%s409_s2] ss:$0 sm:$0xff] }
  0x11   :  { %219 = vmatpush3.bf16.msra.mxu0 %v218_v27  ;;  %247 = vmatpush3.bf16.msra.mxu1 %v218_v27 }
  0x12   :  { %221 = vmatprep.subr.bf16.mxu0 %v220_v28  ;;  %240 = vmatprep.subr.bf16.mxu1 %v220_v28 }
  0x15   :  { %223 = vmatpush3.bf16.msra.mxu0 %v222_v33  ;;  %248 = vmatpush3.bf16.msra.mxu1 %v222_v33 }
  0x16   :  { %225 = vmatprep.subr.bf16.mxu0 %v224_v34  ;;  %241 = vmatprep.subr.bf16.mxu1 %v224_v34 }
  0x19   :  { %227 = vmatpush3.bf16.msra.mxu0 %v226_v39  ;;  %249 = vmatpush3.bf16.msra.mxu1 %v226_v39 }
  0x1a   :  { %229 = vmatprep.subr.bf16.mxu0 %v228_v40  ;;  %242 = vmatprep.subr.bf16.mxu1 %v228_v40 }
  0x1d   :  { %231 = vmatpush3.bf16.msra.mxu0 %v230_v45  ;;  %250 = vmatpush3.bf16.msra.mxu1 %v230_v45 }
  0x1e   :  { %233 = vmatprep.subr.bf16.mxu0 %v232_v46  ;;  %243 = vmatprep.subr.bf16.mxu1 %v232_v46 }
  0x21   :  { %235 = vmatpush3.bf16.msra.mxu0 %v234_v49  ;;  %251 = vmatpush3.bf16.msra.mxu1 %v234_v49 }
  0x24   :  { %126 = vmatmul.mubr.f32.vlgmr.msra.gmra.mrb[0].mxu0 %v14_v50  ;;  %136 = vmatmul.mubr.f32.vlgmr.msra.gmra.mrb[0].mxu1 %v18_v51 }
  0x25   :  { %130 = vmatprep.mubr.f32.mxu0 %v17_v52  ;;  %140 = vmatprep.mubr.f32.mxu1 %v21_v53 }
  0x28   :  { %131 = vmatmul.mubr.f32.gmra.mrb[2].mxu0 %v16_v54  ;;  %141 = vmatmul.mubr.f32.gmra.mrb[2].mxu1 %v20_v55 }
  0xf7   :  { %v192_v56 = vpop.f32.mrb[0].mxu0  ;;  %v198_v57 = vpop.f32.mrb[0].mxu1 }
  0xf8   :  { %v193_v59 = vpop.f32.mrb[1].mxu0  ;;  %v199_v60 = vpop.f32.mrb[1].mxu1 }
  0xf9   :  { %v194_v61 = vadd.f32 %v193_v59, %v192_v56  ;;  %v200_v62 = vadd.f32 %v199_v60, %v198_v57 }
  0xfb   :  { %v128_v63 = vadd.f32 %v194_v61, %v159_v58  ;;  %v138_v0 = vadd.f32 %v200_v62, %v159_v58  ;;  %v195_v1 = vpop.f32.mrb[2].mxu0  ;;  %v201_v2 = vpop.f32.mrb[2].mxu1 }
  0xfc   :  { %v196_v3 = vpop.f32.mrb[3].mxu0  ;;  %v202_v4 = vpop.f32.mrb[3].mxu1 }
  0xfd   :  { %v146_v5 = vmax.f32 %v128_v63, 0.0  ;;  %v148_v6 = vmax.f32 %v138_v0, 0.0  ;;  %v197_v7 = vadd.f32 %v196_v3, %v195_v1  ;;  %v203_v8 = vadd.f32 %v202_v4, %v201_v2 }
  0xff   :  { %151 = vst.msk [vmem:[%s410_s3] sm:$0xff] %vm150_vm0, %v146_v5  ;;  %153 = vst.msk [vmem:[%s410_s3 + $0x10] sm:$0xff] %vm150_vm0, %v148_v6  ;;  %v133_v9 = vadd.f32 %v197_v7, %v159_v58  ;;  %v143_v10 = vadd.f32 %v203_v8, %v159_v58 }
 0x101   :  { %v147_v11 = vmax.f32 %v133_v9, 0.0  ;;  %v149_v12 = vmax.f32 %v143_v10, 0.0 }
 0x103   :  { %152 = vst.msk [vmem:[%s410_s3 + $0x8] sm:$0xff] %vm150_vm0, %v147_v11  ;;  %154 = vst.msk [vmem:[%s410_s3 + $0x18] sm:$0xff] %vm150_vm0, %v149_v12 }

// kernel: model_forward.13
= control target key start
LH: loop header
LB: loop body
LE: loop exit
PB: predicated region body
PF: predicated region fallthrough
CT: control target
= control target key end

     0   :  { %vm69_vm0 = vcmask 261120   ;;  %s558_s1 = inlined_call_operand.vmem [shape: f32[288,32], index: 1, kind: input, shape index: {}]   ;;  %s559_s0 = inlined_call_operand.vmem [shape: f32[32,288], index: 0, kind: input, shape index: {}]   ;;  %s560_s2 = inlined_call_operand.vmem [shape: f32[1,32], index: 2, kind: input, shape index: {}]   ;;  %s561_s3 = inlined_call_operand.vmem [shape: f32[32,32], index: 3, kind: output, shape index: {}]  }
   0x1   :  { %v42_v0 = vld [vmem:[%s558_s1 + $0x80] sm:$0xff]  ;;  %v43_v1 = vld [vmem:[%s558_s1 + $0x88] sm:$0xff]  ;;  %v44_v5 = vld [vmem:[%s558_s1 + $0x90] sm:$0xff] }
   0x2   :  { %v26_v2 = vld [vmem:[%s558_s1] sm:$0xff]  ;;  %v331_v3 = vpack.c.bf16 %v43_v1, %v42_v0  ;;  %v27_v4 = vld [vmem:[%s558_s1 + $0x8] sm:$0xff]  ;;  %v45_v6 = vld [vmem:[%s558_s1 + $0x98] sm:$0xff] }
   0x3   :  { %v333_v7 = vpack.c.bf16 %v27_v4, %v26_v2  ;;  %v335_v8 = vpack.c.bf16 %v45_v6, %v44_v5  ;;  %v28_v9 = vld [vmem:[%s558_s1 + $0x10] sm:$0xff]  ;;  %v29_v10 = vld [vmem:[%s558_s1 + $0x18] sm:$0xff]  ;;  %v46_v11 = vld [vmem:[%s558_s1 + $0xa0] sm:$0xff] }
   0x4   :  { %332 = vmatprep.subr.bf16.mxu0 %v331_v3  ;;  %v47_v12 = vld [vmem:[%s558_s1 + $0xa8] sm:$0xff]  ;;  %v337_v13 = vpack.c.bf16 %v29_v10, %v28_v9  ;;  %v30_v15 = vld [vmem:[%s558_s1 + $0x20] sm:$0xff]  ;;  %v48_v17 = vld [vmem:[%s558_s1 + $0xb0] sm:$0xff] }
   0x5   :  { %334 = vmatpush3.bf16.msra.mxu0 %v333_v7  ;;  %v339_v14 = vpack.c.bf16 %v47_v12, %v46_v11  ;;  %v31_v16 = vld [vmem:[%s558_s1 + $0x28] sm:$0xff]  ;;  %v49_v18 = vld [vmem:[%s558_s1 + $0xb8] sm:$0xff]  ;;  %v32_v21 = vld [vmem:[%s558_s1 + $0x30] sm:$0xff] }
   0x6   :  { %336 = vmatprep.subr.bf16.mxu0 %v335_v8  ;;  %v341_v19 = vpack.c.bf16 %v31_v16, %v30_v15  ;;  %v343_v20 = vpack.c.bf16 %v49_v18, %v48_v17  ;;  %v33_v22 = vld [vmem:[%s558_s1 + $0x38] sm:$0xff]  ;;  %v50_v23 = vld [vmem:[%s558_s1 + $0xc0] sm:$0xff]  ;;  %v51_v24 = vld [vmem:[%s558_s1 + $0xc8] sm:$0xff] }
   0x7   :  { %v58_v25 = vld [vmem:[%s558_s1 + $0x100] sm:$0xff]  ;;  %v59_v26 = vld [vmem:[%s558_s1 + $0x108] sm:$0xff]  ;;  %v345_v29 = vpack.c.bf16 %v33_v22, %v32_v21  ;;  %v60_v30 = vld [vmem:[%s558_s1 + $0x110] sm:$0xff]  ;;  %v347_v32 = vpack.c.bf16 %v51_v24, %v50_v23 }
   0x8   :  { %v363_v27 = vpack.c.bf16 %v59_v26, %v58_v25  ;;  %v15_v28 = vld [vmem:[%s559_s0 + $0x8] sm:$0xff]  ;;  %v61_v31 = vld [vmem:[%s558_s1 + $0x118] sm:$0xff]  ;;  %v34_v33 = vld [vmem:[%s558_s1 + $0x40] sm:$0xff] }
   0x9   :  { %338 = vmatpush3.bf16.msra.mxu0 %v337_v13  ;;  %146 = vmatprep.mubr.f32.mxu0 %v15_v28  ;;  %v35_v34 = vld [vmem:[%s558_s1 + $0x48] sm:$0xff]  ;;  %v367_v35 = vpack.c.bf16 %v61_v31, %v60_v30  ;;  %v16_v36 = vld [vmem:[%s559_s0 + $0x10] sm:$0xff]  ;;  %v53_v38 = vld [vmem:[%s558_s1 + $0xd8] sm:$0xff] }
   0xa   :  { %340 = vmatprep.subr.bf16.mxu0 %v339_v14  ;;  %364 = vmatprep.subr.bf16.mxu1 %v363_v27  ;;  %v52_v37 = vld [vmem:[%s558_s1 + $0xd0] sm:$0xff]  ;;  %v349_v39 = vpack.c.bf16 %v35_v34, %v34_v33  ;;  %v37_v42 = vld [vmem:[%s558_s1 + $0x58] sm:$0xff]  ;;  %v54_v43 = vld [vmem:[%s558_s1 + $0xe0] sm:$0xff] }
   0xb   :  { %366 = vmatpush3.bf16.msra.mxu1 %v363_v27  ;;  %325 = vmatprep.mubr.msk.f32.mxu1 %vm69_vm0, %v16_v36  ;;  %v351_v40 = vpack.c.bf16 %v53_v38, %v52_v37  ;;  %v36_v41 = vld [vmem:[%s558_s1 + $0x50] sm:$0xff]  ;;  %v55_v44 = vld [vmem:[%s558_s1 + $0xe8] sm:$0xff]  ;;  %v22_v46 = vld [vmem:[%s559_s0 + $0x40] sm:$0xff] }
   0xc   :  { %368 = vmatprep.subr.bf16.mxu1 %v367_v35  ;;  %v19_v45 = vld [vmem:[%s559_s0 + $0x28] sm:$0xff]  ;;  %v353_v47 = vpack.c.bf16 %v37_v42, %v36_v41  ;;  %v355_v48 = vpack.c.bf16 %v55_v44, %v54_v43  ;;  %v38_v49 = vld [vmem:[%s558_s1 + $0x60] sm:$0xff]  ;;  %v56_v51 = vld [vmem:[%s558_s1 + $0xf0] sm:$0xff] }
   0xd   :  { %342 = vmatpush3.bf16.msra.mxu0 %v341_v19  ;;  %v39_v50 = vld [vmem:[%s558_s1 + $0x68] sm:$0xff]  ;;  %v57_v52 = vld [vmem:[%s558_s1 + $0xf8] sm:$0xff]  ;;  %v40_v56 = vld [vmem:[%s558_s1 + $0x70] sm:$0xff] }
   0xe   :  { %344 = vmatprep.subr.bf16.mxu0 %v343_v20  ;;  %v25_v53 = vld [vmem:[%s559_s0 + $0x58] sm:$0xff]  ;;  %v357_v54 = vpack.c.bf16 %v39_v50, %v38_v49  ;;  %v359_v55 = vpack.c.bf16 %v57_v52, %v56_v51  ;;  %v14_v59 = vld [vmem:[%s559_s0] sm:$0xff]  ;;  %v20_v63 = vld [vmem:[%s559_s0 + $0x30] sm:$0xff] }
   0xf   :  { %370 = vmatpush3.bf16.msra.mxu1 %v367_v35  ;;  %v41_v57 = vld [vmem:[%s558_s1 + $0x78] sm:$0xff]  ;;  %v18_v60 = vld [vmem:[%s559_s0 + $0x20] sm:$0xff]  ;;  %v24_v0 = vld [vmem:[%s559_s0 + $0x50] sm:$0xff] }
  0x10   :  { %v361_v58 = vpack.c.bf16 %v41_v57, %v40_v56  ;;  %v17_v61 = vld [vmem:[%s559_s0 + $0x18] sm:$0xff]  ;;  %v23_v1 = vld [vmem:[%s559_s0 + $0x48] sm:$0xff]  ;;  %v260_v8 = vld [vmem:[%s560_s2] ss:$0 sm:$0xff] }
  0x11   :  { %346 = vmatpush3.bf16.msra.mxu0 %v345_v29  ;;  %v21_v62 = vld [vmem:[%s559_s0 + $0x38] sm:$0xff] }
  0x12   :  { %348 = vmatprep.subr.bf16.mxu0 %v347_v32  ;;  %326 = vmatmul.mubr.msk.f32.vlgmr.msra.gmra.mrb[0].mxu1 %vm69_vm0, %v19_v45 }
  0x13   :  { %328 = vmatprep.mubr.msk.f32.mxu1 %vm69_vm0, %v22_v46 }
  0x15   :  { %350 = vmatpush3.bf16.msra.mxu0 %v349_v39 }
  0x16   :  { %352 = vmatprep.subr.bf16.mxu0 %v351_v40  ;;  %329 = vmatmul.mubr.msk.f32.gmra.mrb[2].mxu1 %vm69_vm0, %v25_v53 }
  0x19   :  { %354 = vmatpush3.bf16.msra.mxu0 %v353_v47 }
  0x1a   :  { %356 = vmatprep.subr.bf16.mxu0 %v355_v48 }
  0x1d   :  { %358 = vmatpush3.bf16.msra.mxu0 %v357_v54 }
  0x1e   :  { %360 = vmatprep.subr.bf16.mxu0 %v359_v55 }
  0x21   :  { %362 = vmatpush3.bf16.msra.mxu0 %v361_v58 }
  0x24   :  { %147 = vmatmul.mubr.f32.vlgmr.msra.gmra.mrb[0].mxu0 %v14_v59 }
  0x25   :  { %151 = vmatprep.mubr.f32.mxu0 %v18_v60 }
  0x28   :  { %152 = vmatmul.mubr.f32.gmra.mrb[2].mxu0 %v17_v61 }
  0x29   :  { %156 = vmatprep.mubr.f32.mxu0 %v21_v62 }
  0x2c   :  { %157 = vmatmul.mubr.f32.gmra.mrb[4].mxu0 %v20_v63 }
  0x2d   :  { %161 = vmatprep.mubr.f32.mxu0 %v24_v0 }
  0x30   :  { %162 = vmatmul.mubr.f32.gmra.mrb[6].mxu0 %v23_v1 }
  0xe5   :  { %v327_v2 = vpop.f32.mrb[0].mxu1 }
  0xe6   :  { %v233_v3 = vpop.f32.mrb[1].mxu1 }
  0xe9   :  { %v330_v4 = vpop.f32.mrb[2].mxu1 }
  0xea   :  { %v243_v5 = vpop.f32.mrb[3].mxu1 }
  0xf7   :  { %v297_v6 = vpop.f32.mrb[0].mxu0 }
  0xf8   :  { %v298_v7 = vpop.f32.mrb[1].mxu0 }
  0xf9   :  { %v299_v9 = vadd.f32 %v298_v7, %v297_v6 }
  0xfb   :  { %v300_v10 = vpop.f32.mrb[2].mxu0  ;;  %v149_v11 = vadd.f32 %v299_v9, %v260_v8 }
  0xfc   :  { %v301_v12 = vpop.f32.mrb[3].mxu0 }
  0xfd   :  { %v302_v13 = vadd.f32 %v301_v12, %v300_v10  ;;  %v234_v14 = vadd.f32 %v233_v3, %v149_v11 }
  0xff   :  { %v154_v15 = vadd.f32 %v302_v13, %v260_v8  ;;  %252 = vst.msk [vmem:[%s561_s3] sm:$0xff] %vm69_vm0, %v234_v14  ;;  %v303_v16 = vpop.f32.mrb[4].mxu0 }
 0x100   :  { %v304_v17 = vpop.f32.mrb[5].mxu0 }
 0x101   :  { %v239_v18 = vadd.f32 %v327_v2, %v154_v15  ;;  %v305_v19 = vadd.f32 %v304_v17, %v303_v16 }
 0x103   :  { %253 = vst.msk [vmem:[%s561_s3 + $0x8] sm:$0xff] %vm69_vm0, %v239_v18  ;;  %v306_v20 = vpop.f32.mrb[6].mxu0  ;;  %v159_v21 = vadd.f32 %v305_v19, %v260_v8 }
 0x104   :  { %v307_v22 = vpop.f32.mrb[7].mxu0 }
 0x105   :  { %v308_v23 = vadd.f32 %v307_v22, %v306_v20  ;;  %v244_v24 = vadd.f32 %v243_v5, %v159_v21 }
 0x107   :  { %v164_v25 = vadd.f32 %v308_v23, %v260_v8  ;;  %254 = vst.msk [vmem:[%s561_s3 + $0x10] sm:$0xff] %vm69_vm0, %v244_v24 }
 0x109   :  { %v249_v26 = vadd.f32 %v330_v4, %v164_v25 }
 0x10b   :  { %255 = vst.msk [vmem:[%s561_s3 + $0x18] sm:$0xff] %vm69_vm0, %v249_v26 }

// kernel: model_forward.14
= control target key start
LH: loop header
LB: loop body
LE: loop exit
PB: predicated region body
PF: predicated region fallthrough
CT: control target
= control target key end

     0   :  { %vm101_vm2 = vcmask 261120   ;;  %vm284_vm13 = vcmask 64512   ;;  %s863_s2 = inlined_call_operand.vmem [shape: f32[288,8], index: 2, kind: input, shape index: {}]   ;;  %s864_s0 = inlined_call_operand.vmem [shape: f32[32,288], index: 0, kind: input, shape index: {}]   ;;  %s865_s3 = inlined_call_operand.vmem [shape: f32[8,32], index: 3, kind: input, shape index: {}]   ;;  %s866_s1 = inlined_call_operand.vmem [shape: f32[32,32], index: 1, kind: input, shape index: {}]   ;;  %s867_s4 = inlined_call_operand.vmem [shape: f32[32,32], index: 4, kind: output, shape index: {}]  }
   0x1   :  { %v81_v0 = vld [vmem:[%s863_s2 + $0x80] sm:$0xff]  ;;  %v82_v1 = vld [vmem:[%s863_s2 + $0x88] sm:$0xff]  ;;  %v83_v5 = vld [vmem:[%s863_s2 + $0x90] sm:$0xff] }
   0x2   :  { %v65_v2 = vld [vmem:[%s863_s2] sm:$0xff]  ;;  %v595_v3 = vpack.c.bf16 %v82_v1, %v81_v0  ;;  %v66_v4 = vld [vmem:[%s863_s2 + $0x8] sm:$0xff]  ;;  %v84_v6 = vld [vmem:[%s863_s2 + $0x98] sm:$0xff] }
   0x3   :  { %v597_v7 = vpack.c.bf16 %v66_v4, %v65_v2  ;;  %v599_v8 = vpack.c.bf16 %v84_v6, %v83_v5  ;;  %v67_v9 = vld [vmem:[%s863_s2 + $0x10] sm:$0xff]  ;;  %v68_v10 = vld [vmem:[%s863_s2 + $0x18] sm:$0xff]  ;;  %v85_v11 = vld [vmem:[%s863_s2 + $0xa0] sm:$0xff] }
   0x4   :  { %596 = vmatprep.subr.bf16.mxu0 %v595_v3  ;;  %v86_v12 = vld [vmem:[%s863_s2 + $0xa8] sm:$0xff]  ;;  %v601_v13 = vpack.c.bf16 %v68_v10, %v67_v9  ;;  %v69_v15 = vld [vmem:[%s863_s2 + $0x20] sm:$0xff]  ;;  %v87_v17 = vld [vmem:[%s863_s2 + $0xb0] sm:$0xff] }
   0x5   :  { %598 = vmatpush3.bf16.msra.mxu0 %v597_v7  ;;  %v603_v14 = vpack.c.bf16 %v86_v12, %v85_v11  ;;  %v70_v16 = vld [vmem:[%s863_s2 + $0x28] sm:$0xff]  ;;  %v88_v18 = vld [vmem:[%s863_s2 + $0xb8] sm:$0xff]  ;;  %v71_v20 = vld [vmem:[%s863_s2 + $0x30] sm:$0xff] }
   0x6   :  { %600 = vmatprep.subr.bf16.mxu0 %v599_v8  ;;  %v605_v19 = vpack.c.bf16 %v70_v16, %v69_v15  ;;  %v607_v21 = vpack.c.bf16 %v88_v18, %v87_v17  ;;  %v72_v22 = vld [vmem:[%s863_s2 + $0x38] sm:$0xff]  ;;  %v97_v23 = vld [vmem:[%s863_s2 + $0x100] sm:$0xff]  ;;  %v98_v24 = vld [vmem:[%s863_s2 + $0x108] sm:$0xff] }
   0x7   :  { %v89_v25 = vld [vmem:[%s863_s2 + $0xc0] sm:$0xff]  ;;  %v90_v26 = vld [vmem:[%s863_s2 + $0xc8] sm:$0xff]  ;;  %v627_v27 = vpack.c.bf16 %v98_v24, %v97_v23  ;;  %v99_v28 = vld [vmem:[%s863_s2 + $0x110] sm:$0xff]  ;;  %v609_v30 = vpack.c.bf16 %v72_v22, %v71_v20 }
   0x8   :  { %v100_v29 = vld [vmem:[%s863_s2 + $0x118] sm:$0xff]  ;;  %v18_v32 = vld [vmem:[%s864_s0 + $0x8] sm:$0xff]  ;;  %v19_v33 = vld [vmem:[%s864_s0 + $0x10] sm:$0xff]  ;;  %v611_v34 = vpack.c.bf16 %v90_v26, %v89_v25 }
   0x9   :  { %602 = vmatpush3.bf16.msra.mxu0 %v601_v13  ;;  %628 = vmatprep.subr.bf16.mxu1 %v627_v27  ;;  %v631_v31 = vpack.c.bf16 %v100_v29, %v99_v28  ;;  %v73_v35 = vld [vmem:[%s863_s2 + $0x40] sm:$0xff]  ;;  %v74_v36 = vld [vmem:[%s863_s2 + $0x48] sm:$0xff]  ;;  %vm30_vm0 = vcmp.gt.f32.partialorder %v18_v32, 0.0  ;;  %v42_v37 = vmul.f32 0.01, %v18_v32  ;;  %v91_v38 = vld [vmem:[%s863_s2 + $0xd0] sm:$0xff] }
   0xa   :  { %604 = vmatprep.subr.bf16.mxu0 %v603_v14  ;;  %630 = vmatpush3.bf16.msra.mxu1 %v627_v27  ;;  %v92_v39 = vld [vmem:[%s863_s2 + $0xd8] sm:$0xff]  ;;  %vm31_vm1 = vcmp.gt.f32.partialorder %v19_v33, 0.0  ;;  %v43_v40 = vmul.f32 0.01, %v19_v33  ;;  %v22_v41 = vld [vmem:[%s864_s0 + $0x28] sm:$0xff]  ;;  %v25_v44 = vld [vmem:[%s864_s0 + $0x40] sm:$0xff]  ;;  %v613_v45 = vpack.c.bf16 %v74_v36, %v73_v35 }
   0xb   :  { %632 = vmatprep.subr.bf16.mxu1 %v631_v31  ;;  %v54_v42 = vsel %vm30_vm0, %v18_v32, %v42_v37  ;;  %vm34_vm3 = vcmp.gt.f32.partialorder %v22_v41, 0.0  ;;  %v46_v43 = vmul.f32 0.01, %v22_v41  ;;  %v28_v47 = vld [vmem:[%s864_s0 + $0x58] sm:$0xff]  ;;  %v615_v48 = vpack.c.bf16 %v92_v39, %v91_v38  ;;  %v75_v49 = vld [vmem:[%s863_s2 + $0x50] sm:$0xff]  ;;  %v93_v52 = vld [vmem:[%s863_s2 + $0xe0] sm:$0xff] }
   0xc   :  { %178 = vmatprep.mubr.f32.mxu0 %v54_v42  ;;  %v55_v46 = vsel %vm31_vm1, %v19_v33, %v43_v40  ;;  %v76_v50 = vld [vmem:[%s863_s2 + $0x58] sm:$0xff]  ;;  %v94_v53 = vld [vmem:[%s863_s2 + $0xe8] sm:$0xff]  ;;  %vm37_vm4 = vcmp.gt.f32.partialorder %v25_v44, 0.0  ;;  %v49_v54 = vmul.f32 0.01, %v25_v44  ;;  %vm40_vm5 = vcmp.gt.f32.partialorder %v28_v47, 0.0 }
   0xd   :  { %606 = vmatpush3.bf16.msra.mxu0 %v605_v19  ;;  %v58_v51 = vsel %vm34_vm3, %v22_v41, %v46_v43  ;;  %581 = vmatprep.mubr.msk.f32.mxu1 %vm101_vm2, %v55_v46  ;;  %v617_v55 = vpack.c.bf16 %v76_v50, %v75_v49  ;;  %v52_v56 = vmul.f32 0.01, %v28_v47  ;;  %v619_v57 = vpack.c.bf16 %v94_v53, %v93_v52  ;;  %v77_v58 = vld [vmem:[%s863_s2 + $0x60] sm:$0xff]  ;;  %v78_v59 = vld [vmem:[%s863_s2 + $0x68] sm:$0xff]  ;;  %v95_v61 = vld [vmem:[%s863_s2 + $0xf0] sm:$0xff] }
   0xe   :  { %608 = vmatprep.subr.bf16.mxu0 %v607_v21  ;;  %634 = vmatpush3.bf16.msra.mxu1 %v631_v31  ;;  %v61_v60 = vsel %vm37_vm4, %v25_v44, %v49_v54  ;;  %v96_v62 = vld [vmem:[%s863_s2 + $0xf8] sm:$0xff]  ;;  %v621_v0 = vpack.c.bf16 %v78_v59, %v77_v58  ;;  %v79_v2 = vld [vmem:[%s863_s2 + $0x70] sm:$0xff]  ;;  %v17_v4 = vld [vmem:[%s864_s0] sm:$0xff] }
   0xf   :  { %v64_v63 = vsel %vm40_vm5, %v28_v47, %v52_v56  ;;  %v623_v1 = vpack.c.bf16 %v96_v62, %v95_v61  ;;  %v80_v3 = vld [vmem:[%s863_s2 + $0x78] sm:$0xff]  ;;  %v21_v5 = vld [vmem:[%s864_s0 + $0x20] sm:$0xff]  ;;  %v41_v7 = vmul.f32 0.01, %v17_v4  ;;  %vm29_vm6 = vcmp.gt.f32.partialorder %v17_v4, 0.0  ;;  %v23_v15 = vld [vmem:[%s864_s0 + $0x30] sm:$0xff] }
  0x10   :  { %v625_v6 = vpack.c.bf16 %v80_v3, %v79_v2  ;;  %v45_v8 = vmul.f32 0.01, %v21_v5  ;;  %v20_v9 = vld [vmem:[%s864_s0 + $0x18] sm:$0xff]  ;;  %vm33_vm7 = vcmp.gt.f32.partialorder %v21_v5, 0.0  ;;  %v27_v16 = vld [vmem:[%s864_s0 + $0x50] sm:$0xff]  ;;  %vm35_vm10 = vcmp.gt.f32.partialorder %v23_v15, 0.0 }
  0x11   :  { %610 = vmatpush3.bf16.msra.mxu0 %v609_v30  ;;  %582 = vmatmul.mubr.msk.f32.vlgmr.msra.gmra.mrb[0].mxu1 %vm101_vm2, %v58_v51  ;;  %v24_v10 = vld [vmem:[%s864_s0 + $0x38] sm:$0xff]  ;;  %v53_v11 = vsel %vm29_vm6, %v17_v4, %v41_v7  ;;  %v44_v12 = vmul.f32 0.01, %v20_v9  ;;  %vm32_vm8 = vcmp.gt.f32.partialorder %v20_v9, 0.0  ;;  %v47_v18 = vmul.f32 0.01, %v23_v15 }
  0x12   :  { %612 = vmatprep.subr.bf16.mxu0 %v611_v34  ;;  %584 = vmatprep.mubr.msk.f32.mxu1 %vm101_vm2, %v61_v60  ;;  %v57_v13 = vsel %vm33_vm7, %v21_v5, %v45_v8  ;;  %v48_v14 = vmul.f32 0.01, %v24_v10  ;;  %vm36_vm9 = vcmp.gt.f32.partialorder %v24_v10, 0.0  ;;  %v51_v20 = vmul.f32 0.01, %v27_v16  ;;  %v26_v21 = vld [vmem:[%s864_s0 + $0x48] sm:$0xff] }
  0x13   :  { %v56_v17 = vsel %vm32_vm8, %v20_v9, %v44_v12  ;;  %vm39_vm11 = vcmp.gt.f32.partialorder %v27_v16, 0.0  ;;  %v59_v22 = vsel %vm35_vm10, %v23_v15, %v47_v18  ;;  %v50_v23 = vmul.f32 0.01, %v26_v21  ;;  %v340_v26 = vld [vmem:[%s865_s3] sm:$0xff] }
  0x14   :  { %v60_v19 = vsel %vm36_vm9, %v24_v10, %v48_v14  ;;  %v63_v24 = vsel %vm39_vm11, %v27_v16, %v51_v20  ;;  %vm38_vm12 = vcmp.gt.f32.partialorder %v26_v21, 0.0  ;;  %587 = vmatprep.subr.mxu1 %v340_v26 }
  0x15   :  { %614 = vmatpush3.bf16.msra.mxu0 %v613_v45  ;;  %585 = vmatmul.mubr.msk.f32.gmra.mrb[2].mxu1 %vm101_vm2, %v64_v63  ;;  %v62_v25 = vsel %vm38_vm12, %v26_v21, %v50_v23 }
  0x16   :  { %616 = vmatprep.subr.bf16.mxu0 %v615_v48  ;;  %588 = vmatpush3.msra.mxu1 %v340_v26 }
  0x19   :  { %618 = vmatpush3.bf16.msra.mxu0 %v617_v55 }
  0x1a   :  { %620 = vmatprep.subr.bf16.mxu0 %v619_v57 }
  0x1d   :  { %622 = vmatpush3.bf16.msra.mxu0 %v621_v0 }
  0x1e   :  { %624 = vmatprep.subr.bf16.mxu0 %v623_v1 }
  0x21   :  { %626 = vmatpush3.bf16.msra.mxu0 %v625_v6 }
  0x24   :  { %179 = vmatmul.mubr.f32.vlgmr.msra.gmra.mrb[0].mxu0 %v53_v11 }
  0x25   :  { %183 = vmatprep.mubr.f32.mxu0 %v57_v13 }
  0x28   :  { %184 = vmatmul.mubr.f32.gmra.mrb[2].mxu0 %v56_v17 }
  0x29   :  { %188 = vmatprep.mubr.f32.mxu0 %v60_v19 }
  0x2c   :  { %189 = vmatmul.mubr.f32.gmra.mrb[4].mxu0 %v59_v22 }
  0x2d   :  { %193 = vmatprep.mubr.f32.mxu0 %v63_v24 }
  0x30   :  { %194 = vmatmul.mubr.f32.gmra.mrb[6].mxu0 %v62_v25 }
  0xe4   :  { %v583_v27 = vpop.f32.mrb[0].mxu1 }
  0xe5   :  { %v265_v28 = vpop.f32.mrb[1].mxu1 }
  0xe8   :  { %v586_v29 = vpop.f32.mrb[2].mxu1 }
  0xe9   :  { %v275_v30 = vpop.f32.mrb[3].mxu1 }
  0xf7   :  { %v548_v31 = vpop.f32.mrb[0].mxu0 }
  0xf8   :  { %v549_v32 = vpop.f32.mrb[1].mxu0 }
  0xf9   :  { %v550_v33 = vadd.f32 %v549_v32, %v548_v31 }
  0xfb   :  { %v266_v34 = vadd.f32 %v550_v33, %v265_v28  ;;  %v551_v35 = vpop.f32.mrb[2].mxu0 }
  0xfc   :  { %v552_v36 = vpop.f32.mrb[3].mxu0 }
  0xfd   :  { %v553_v37 = vadd.f32 %v552_v36, %v551_v35  ;;  %v285_v41 = vsel %vm284_vm13, %v266_v34, 0.0 }
  0xff   :  { %v271_v38 = vadd.f32 %v583_v27, %v553_v37  ;;  %v554_v39 = vpop.f32.mrb[4].mxu0 }
 0x100   :  { %v555_v40 = vpop.f32.mrb[5].mxu0 }
 0x101   :  { %v286_v42 = vsel %vm284_vm13, %v271_v38, 0.0  ;;  %v556_v43 = vadd.f32 %v555_v40, %v554_v39 }
 0x102   :  { %v287_v44 = vadd.f32 %v286_v42, %v285_v41 }
 0x103   :  { %v276_v45 = vadd.f32 %v556_v43, %v275_v30  ;;  %v557_v46 = vpop.f32.mrb[6].mxu0 }
 0x104   :  { %v558_v47 = vpop.f32.mrb[7].mxu0 }
 0x105   :  { %v288_v48 = vsel %vm284_vm13, %v276_v45, 0.0  ;;  %v559_v49 = vadd.f32 %v558_v47, %v557_v46 }
 0x106   :  { %v289_v50 = vadd.f32 %v288_v48, %v287_v44 }
 0x107   :  { %v281_v51 = vadd.f32 %v586_v29, %v559_v49 }
 0x109   :  { %v290_v52 = vsel %vm284_vm13, %v281_v51, 0.0 }
 0x10a   :  { %v291_v53 = vadd.f32 %v290_v52, %v289_v50 }
 0x10c   :  { %v292_v54 = vrot.slane %v291_v53, 4 }
 0x10e   :  { %v293_v55 = vadd.f32 %v292_v54, %v291_v53 }
 0x110   :  { %v294_v56 = vrot.slane %v293_v55, 2 }
 0x112   :  { %v295_v57 = vadd.f32 %v294_v56, %v293_v55 }
 0x114   :  { %v296_v58 = vrot.slane %v295_v57, 1 }
 0x116   :  { %v297_v59 = vadd.f32 %v296_v58, %v295_v57 }
 0x118   :  { %v299_v60 = vmul.f32 0.03125, %v297_v59 }
 0x11a   :  { %v300_v61 = vsub.f32 %v266_v34, %v299_v60  ;;  %v301_v62 = vsub.f32 %v271_v38, %v299_v60  ;;  %v302_v63 = vsub.f32 %v276_v45, %v299_v60  ;;  %v303_v0 = vsub.f32 %v281_v51, %v299_v60 }
 0x11c   :  { %v304_v1 = vmul.f32 %v300_v61, %v300_v61  ;;  %v305_v2 = vmul.f32 %v301_v62, %v301_v62  ;;  %v306_v3 = vmul.f32 %v302_v63, %v302_v63  ;;  %v307_v4 = vmul.f32 %v303_v0, %v303_v0 }
 0x11e   :  { %v308_v5 = vsel %vm284_vm13, %v304_v1, 0.0  ;;  %v309_v6 = vsel %vm284_vm13, %v305_v2, 0.0  ;;  %v311_v8 = vsel %vm284_vm13, %v306_v3, 0.0  ;;  %v313_v10 = vsel %vm284_vm13, %v307_v4, 0.0 }
 0x11f   :  { %v310_v7 = vadd.f32 %v309_v6, %v308_v5 }
 0x121   :  { %v312_v9 = vadd.f32 %v311_v8, %v310_v7 }
 0x123   :  { %v314_v11 = vadd.f32 %v313_v10, %v312_v9  ;;  %v480_v10 = vld [vmem:[%s866_s1] sm:$0xff] }
 0x124   :  { %vm484_vm3 = vcmp.gt.f32.partialorder %v480_v10, 0.0 }
 0x125   :  { %v315_v12 = vrot.slane %v314_v11, 4 }
 0x127   :  { %v316_v13 = vadd.f32 %v315_v12, %v314_v11  ;;  %v481_v11 = vld [vmem:[%s866_s1 + $0x8] sm:$0xff]  ;;  %v482_v12 = vld [vmem:[%s866_s1 + $0x10] sm:$0xff] }
 0x128   :  { %vm485_vm4 = vcmp.gt.f32.partialorder %v481_v11, 0.0  ;;  %vm486_vm5 = vcmp.gt.f32.partialorder %v482_v12, 0.0 }
 0x129   :  { %v317_v14 = vrot.slane %v316_v13, 2 }
 0x12b   :  { %v318_v15 = vadd.f32 %v317_v14, %v316_v13  ;;  %v483_v13 = vld [vmem:[%s866_s1 + $0x18] sm:$0xff]  ;;  %v488_v14 = vmul.f32 0.01, %v480_v10 }
 0x12c   :  { %vm487_vm6 = vcmp.gt.f32.partialorder %v483_v13, 0.0 }
 0x12d   :  { %v319_v16 = vrot.slane %v318_v15, 1 }
 0x12f   :  { %v320_v17 = vadd.f32 %v319_v16, %v318_v15  ;;  %v489_v15 = vmul.f32 0.01, %v481_v11  ;;  %v490_v16 = vmul.f32 0.01, %v482_v12 }
 0x131   :  { %v321_v18 = vmul.f32 0.03125, %v320_v17  ;;  %v491_v17 = vmul.f32 0.01, %v483_v13 }
 0x133   :  { %v322_v19 = vadd.f32 1e-05, %v321_v18 }
 0x135   :  { %635 = vrsqrt.f32 %v322_v19  ;;  %v492_v19 = vsel %vm484_vm3, %v480_v10, %v488_v14 }
 0x13f   :  { %v636_v20 = vpop.eup %635 }
 0x140   :  { %v327_v21 = vmul.f32 %v636_v20, %v303_v0  ;;  %v324_v22 = vmul.f32 %v636_v20, %v300_v61  ;;  %v325_v23 = vmul.f32 %v636_v20, %v301_v62  ;;  %v326_v24 = vmul.f32 %v636_v20, %v302_v63 }
 0x141   :  { %v493_v20 = vsel %vm485_vm4, %v481_v11, %v489_v15 }
 0x142   :  { %vm328_vm14 = vcmp.gt.f32.partialorder %v324_v22, 0.0  ;;  %v332_v25 = vmul.f32 0.01, %v324_v22  ;;  %vm329_vm15 = vcmp.gt.f32.partialorder %v325_v23, 0.0  ;;  %v333_v26 = vmul.f32 0.01, %v325_v23 }
 0x143   :  { %vm330_vm0 = vcmp.gt.f32.partialorder %v326_v24, 0.0  ;;  %v334_v27 = vmul.f32 0.01, %v326_v24  ;;  %v335_v30 = vmul.f32 0.01, %v327_v21  ;;  %vm331_vm1 = vcmp.gt.f32.partialorder %v327_v21, 0.0 }
 0x144   :  { %v336_v28 = vsel %vm328_vm14, %v324_v22, %v332_v25  ;;  %v337_v29 = vsel %vm329_vm15, %v325_v23, %v333_v26  ;;  %v495_v22 = vsel %vm487_vm6, %v483_v13, %v491_v17 }
 0x145   :  { %589 = vmatprep.mubr.msk.f32.mxu1 %vm284_vm13, %v336_v28  ;;  %v338_v31 = vsel %vm330_vm0, %v326_v24, %v334_v27  ;;  %v339_v32 = vsel %vm331_vm1, %v327_v21, %v335_v30  ;;  %v494_v21 = vsel %vm486_vm5, %v482_v12, %v490_v16 }
 0x146   :  { %590 = vmatmul.mubr.msk.f32.vlgmr.msra.gmra.mrb[4].mxu1 %vm284_vm13, %v337_v29 }
 0x147   :  { %592 = vmatprep.mubr.msk.f32.mxu1 %vm284_vm13, %v338_v31 }
 0x14a   :  { %593 = vmatmul.mubr.msk.f32.gmra.mrb[6].mxu1 %vm284_vm13, %v339_v32 }
 0x219   :  { %v591_v33 = vpop.f32.mrb[4].mxu1 }
 0x21a   :  { %v439_v34 = vsel %vm101_vm2, %v591_v33, 0.0  ;;  %v419_v35 = vpop.f32.mrb[5].mxu1 }
 0x21b   :  { %v438_v36 = vsel %vm101_vm2, %v419_v35, 0.0 }
 0x21c   :  { %v440_v37 = vadd.f32 %v439_v34, %v438_v36 }
 0x21d   :  { %v594_v38 = vpop.f32.mrb[6].mxu1 }
 0x21e   :  { %v429_v39 = vpop.f32.mrb[7].mxu1  ;;  %v443_v42 = vsel %vm101_vm2, %v594_v38, 0.0 }
 0x21f   :  { %v441_v40 = vsel %vm101_vm2, %v429_v39, 0.0 }
 0x220   :  { %v442_v41 = vadd.f32 %v441_v40, %v440_v37 }
 0x222   :  { %v444_v43 = vadd.f32 %v443_v42, %v442_v41 }
 0x224   :  { %v445_v44 = vrot.slane %v444_v43, 4 }
 0x226   :  { %v446_v45 = vadd.f32 %v445_v44, %v444_v43 }
 0x228   :  { %v447_v46 = vrot.slane %v446_v45, 2 }
 0x22a   :  { %v448_v47 = vadd.f32 %v447_v46, %v446_v45 }
 0x22c   :  { %v449_v48 = vrot.slane %v448_v47, 1 }
 0x22e   :  { %v450_v49 = vadd.f32 %v449_v48, %v448_v47 }
 0x230   :  { %v451_v50 = vmul.f32 0.03125, %v450_v49 }
 0x232   :  { %v452_v51 = vsub.f32 %v419_v35, %v451_v50  ;;  %v453_v52 = vsub.f32 %v591_v33, %v451_v50  ;;  %v454_v53 = vsub.f32 %v429_v39, %v451_v50  ;;  %v455_v54 = vsub.f32 %v594_v38, %v451_v50 }
 0x234   :  { %v456_v55 = vmul.f32 %v452_v51, %v452_v51  ;;  %v457_v56 = vmul.f32 %v453_v52, %v453_v52  ;;  %v458_v57 = vmul.f32 %v454_v53, %v454_v53  ;;  %v459_v58 = vmul.f32 %v455_v54, %v455_v54 }
 0x236   :  { %v460_v59 = vsel %vm101_vm2, %v456_v55, 0.0  ;;  %v461_v60 = vsel %vm101_vm2, %v457_v56, 0.0  ;;  %v463_v62 = vsel %vm101_vm2, %v458_v57, 0.0  ;;  %v465_v0 = vsel %vm101_vm2, %v459_v58, 0.0 }
 0x237   :  { %v462_v61 = vadd.f32 %v461_v60, %v460_v59 }
 0x239   :  { %v464_v63 = vadd.f32 %v463_v62, %v462_v61 }
 0x23b   :  { %v466_v1 = vadd.f32 %v465_v0, %v464_v63 }
 0x23d   :  { %v467_v2 = vrot.slane %v466_v1, 4 }
 0x23f   :  { %v468_v3 = vadd.f32 %v467_v2, %v466_v1 }
 0x241   :  { %v469_v4 = vrot.slane %v468_v3, 2 }
 0x243   :  { %v470_v5 = vadd.f32 %v469_v4, %v468_v3 }
 0x245   :  { %v471_v6 = vrot.slane %v470_v5, 1 }
 0x247   :  { %v472_v7 = vadd.f32 %v471_v6, %v470_v5 }
 0x249   :  { %v473_v8 = vmul.f32 0.03125, %v472_v7 }
 0x24b   :  { %v474_v9 = vadd.f32 1e-05, %v473_v8 }
 0x24d   :  { %637 = vrsqrt.f32 %v474_v9 }
 0x257   :  { %v638_v18 = vpop.eup %637 }
 0x258   :  { %v476_v23 = vmul.f32 %v638_v18, %v452_v51  ;;  %v477_v24 = vmul.f32 %v638_v18, %v453_v52  ;;  %v478_v25 = vmul.f32 %v638_v18, %v454_v53  ;;  %v479_v26 = vmul.f32 %v638_v18, %v455_v54 }
 0x25a   :  { %v496_v27 = vadd.f32 %v492_v19, %v476_v23  ;;  %v497_v28 = vadd.f32 %v493_v20, %v477_v24  ;;  %v498_v29 = vadd.f32 %v494_v21, %v478_v25  ;;  %v499_v30 = vadd.f32 %v495_v22, %v479_v26 }
 0x25c   :  { %500 = vst.msk [vmem:[%s867_s4] sm:$0xff] %vm101_vm2, %v496_v27  ;;  %501 = vst.msk [vmem:[%s867_s4 + $0x8] sm:$0xff] %vm101_vm2, %v497_v28 }
 0x25d   :  { %502 = vst.msk [vmem:[%s867_s4 + $0x10] sm:$0xff] %vm101_vm2, %v498_v29  ;;  %503 = vst.msk [vmem:[%s867_s4 + $0x18] sm:$0xff] %vm101_vm2, %v499_v30 }

// kernel: model_forward.17
= control target key start
LH: loop header
LB: loop body
LE: loop exit
PB: predicated region body
PF: predicated region fallthrough
CT: control target
= control target key end

     0   :  { %vm34_vm0 = vcmask 588800   ;;  %vm132_vm1 = vcmask 261120   ;;  %s287_s1 = inlined_call_operand.vmem [shape: f32[72,32], index: 1, kind: input, shape index: {}]   ;;  %s288_s0 = inlined_call_operand.vmem [shape: f32[32,72], index: 0, kind: input, shape index: {}]   ;;  %s289_s2 = inlined_call_operand.vmem [shape: f32[1,32], index: 2, kind: input, shape index: {}]   ;;  %s290_s3 = inlined_call_operand.vmem [shape: f32[32,32], index: 3, kind: output, shape index: {}]  }
   0x1   :  { %v18_v0 = vld [vmem:[%s287_s1] sm:$0xff]  ;;  %v19_v1 = vld [vmem:[%s287_s1 + $0x8] sm:$0xff]  ;;  %v20_v2 = vld [vmem:[%s287_s1 + $0x10] sm:$0xff] }
   0x2   :  { %v183_v3 = vpack.c.bf16 %v19_v1, %v18_v0  ;;  %v21_v4 = vld [vmem:[%s287_s1 + $0x18] sm:$0xff]  ;;  %v22_v6 = vld [vmem:[%s287_s1 + $0x20] sm:$0xff]  ;;  %v23_v7 = vld [vmem:[%s287_s1 + $0x28] sm:$0xff] }
   0x3   :  { %v187_v5 = vpack.c.bf16 %v21_v4, %v20_v2  ;;  %v14_v8 = vld [vmem:[%s288_s0] sm:$0xff]  ;;  %v16_v9 = vld [vmem:[%s288_s0 + $0x10] sm:$0xff]  ;;  %v191_v10 = vpack.c.bf16 %v23_v7, %v22_v6  ;;  %v25_v12 = vld [vmem:[%s287_s1 + $0x38] sm:$0xff] }
   0x4   :  { %184 = vmatprep.subr.bf16.mxu0 %v183_v3  ;;  %199 = vmatprep.subr.bf16.mxu1 %v183_v3  ;;  %v24_v11 = vld [vmem:[%s287_s1 + $0x30] sm:$0xff]  ;;  %v26_v14 = vld [vmem:[%s287_s1 + $0x40] sm:$0xff]  ;;  %v15_v15 = vld [vmem:[%s288_s0 + $0x8] sm:$0xff] }
   0x5   :  { %186 = vmatpush3.bf16.msra.mxu0 %v183_v3  ;;  %204 = vmatpush3.bf16.msra.mxu1 %v183_v3  ;;  %v195_v13 = vpack.c.bf16 %v25_v12, %v24_v11  ;;  %v17_v16 = vld [vmem:[%s288_s0 + $0x18] sm:$0xff]  ;;  %v141_v17 = vld [vmem:[%s289_s2] ss:$0 sm:$0xff] }
   0x6   :  { %188 = vmatprep.subr.bf16.mxu0 %v187_v5  ;;  %200 = vmatprep.subr.bf16.mxu1 %v187_v5 }
   0x7   :  { %177 = vmatprep.mubr.msk.f32.mxu0 %vm34_vm0, %v14_v8  ;;  %180 = vmatprep.mubr.msk.f32.mxu1 %vm34_vm0, %v16_v9 }
   0x9   :  { %190 = vmatpush3.bf16.msra.mxu0 %v187_v5  ;;  %205 = vmatpush3.bf16.msra.mxu1 %v187_v5 }
   0xa   :  { %192 = vmatprep.subr.bf16.mxu0 %v191_v10  ;;  %201 = vmatprep.subr.bf16.mxu1 %v191_v10 }
   0xd   :  { %194 = vmatpush3.bf16.msra.mxu0 %v191_v10  ;;  %206 = vmatpush3.bf16.msra.mxu1 %v191_v10 }
   0xe   :  { %196 = vmatprep.subr.bf16.mxu0 %v195_v13  ;;  %202 = vmatprep.subr.bf16.mxu1 %v195_v13 }
  0x11   :  { %198 = vmatpush3.bf16.msra.mxu0 %v195_v13  ;;  %207 = vmatpush3.bf16.msra.mxu1 %v195_v13 }
  0x12   :  { %175 = vmatprep.subr.mxu0 %v26_v14  ;;  %203 = vmatprep.subr.mxu1 %v26_v14 }
  0x15   :  { %176 = vmatpush3.msra.mxu0 %v26_v14  ;;  %208 = vmatpush3.msra.mxu1 %v26_v14 }
  0x16   :  { %178 = vmatmul.mubr.msk.f32.vlgmr.msra.gmra.mrb[0].mxu0 %vm34_vm0, %v15_v15  ;;  %181 = vmatmul.mubr.msk.f32.vlgmr.msra.gmra.mrb[0].mxu1 %vm34_vm0, %v17_v16 }
  0xe9   :  { %v179_v18 = vpop.f32.mrb[0].mxu0  ;;  %v182_v19 = vpop.f32.mrb[0].mxu1 }
  0xea   :  { %v119_v20 = vadd.f32 %v179_v18, %v141_v17  ;;  %v129_v21 = vadd.f32 %v182_v19, %v141_v17  ;;  %v113_v22 = vpop.f32.mrb[1].mxu0  ;;  %v123_v23 = vpop.f32.mrb[1].mxu1 }
  0xeb   :  { %v114_v24 = vadd.f32 %v141_v17, %v113_v22  ;;  %v124_v25 = vadd.f32 %v141_v17, %v123_v23 }
  0xec   :  { %134 = vst.msk [vmem:[%s290_s3 + $0x8] sm:$0xff] %vm132_vm1, %v119_v20  ;;  %136 = vst.msk [vmem:[%s290_s3 + $0x18] sm:$0xff] %vm132_vm1, %v129_v21 }
  0xed   :  { %133 = vst.msk [vmem:[%s290_s3] sm:$0xff] %vm132_vm1, %v114_v24  ;;  %135 = vst.msk [vmem:[%s290_s3 + $0x10] sm:$0xff] %vm132_vm1, %v124_v25 }

// kernel: model_forward.16
= control target key start
LH: loop header
LB: loop body
LE: loop exit
PB: predicated region body
PF: predicated region fallthrough
CT: control target
= control target key end

     0   :  { %12 = vsyncpa [#allocation3], 0  ;;  %vm41_vm0 = vcmask 261120   ;;  %v913_v6 = vmov 0.0|0.0   ;;  %vm145_vm1 = vcmask 64512   ;;  %s1109_s0 = inlined_call_operand.vmem [shape: f32[32,32], index: 0, kind: input, shape index: {}]   ;;  %s1110_s1 = inlined_call_operand.vmem [shape: f32[32,8], index: 1, kind: input, shape index: {}]   ;;  %s1111_s2 = inlined_call_operand.vmem [shape: f32[1,8], index: 2, kind: input, shape index: {}]   ;;  %s1112_s3 = inlined_call_operand.vmem [shape: f32[16,8], index: 3, kind: input, shape index: {}]   ;;  %s1113_s4 = inlined_call_operand.vmem [shape: f32[32,8], index: 4, kind: output, shape index: {0}]   ;;  %s1114_s5 = inlined_call_operand.hbm [shape: f32[1,1], index: 5, kind: output, shape index: {1}]   ;;  %s1115_s6 = inlined_call_operand.hbm [shape: f32[1,1], index: 6, kind: output, shape index: {2}]  }
   0x1   :  { %v30_v0 = vld [vmem:[%s1110_s1] sm:$0xff]  ;;  %v31_v1 = vld [vmem:[%s1110_s1 + $0x8] sm:$0xff]  ;;  %v32_v2 = vld [vmem:[%s1110_s1 + $0x10] sm:$0xff]  ;;  %828 = vmatprep.subr.bf16.mxu1 %v913_v6 }
   0x2   :  { %v820_v3 = vpack.c.bf16 %v31_v1, %v30_v0  ;;  %v33_v4 = vld [vmem:[%s1110_s1 + $0x18] sm:$0xff]  ;;  %v22_v5 = vld [vmem:[%s1109_s0] sm:$0xff]  ;;  %v140_v10 = vld [vmem:[%s1112_s3 + $0x8] sm:$0xff] }
   0x3   :  { %v824_v7 = vpack.c.bf16 %v33_v4, %v32_v2  ;;  %v26_v8 = vmax.f32 %v22_v5, 0.0  ;;  %v139_v9 = vld [vmem:[%s1112_s3] sm:$0xff]  ;;  %v23_v11 = vld [vmem:[%s1109_s0 + $0x8] sm:$0xff] }
   0x4   :  { %821 = vmatprep.subr.bf16.mxu0 %v820_v3 }
   0x5   :  { %823 = vmatpush3.bf16.msra.mxu0 %v820_v3  ;;  %776 = vmatprep.mubr.msk.f32.mxu0 %vm41_vm0, %v26_v8 }
   0x6   :  { %13 = vsyncpa [#allocation5], 0  ;;  %825 = vmatprep.subr.bf16.mxu0 %v824_v7  ;;  %v24_v12 = vld [vmem:[%s1109_s0 + $0x10] sm:$0xff]  ;;  %v832_v13 = vpack.c.bf16 %v140_v10, %v139_v9  ;;  %v27_v14 = vmax.f32 %v23_v11, 0.0  ;;  %v25_v16 = vld [vmem:[%s1109_s0 + $0x18] sm:$0xff]  ;;  %v158_v18 = vmul.f32 %v139_v9, %v139_v9  ;;  %v159_v19 = vmul.f32 %v140_v10, %v140_v10  ;;  %s918_s24 = smov [#allocation2]  }
   0x7   :  { %vm830_vm2 = vmpackc.low %vm145_vm1, %vm145_vm1  ;;  %v28_v15 = vmax.f32 %v24_v12, 0.0  ;;  %v29_v17 = vmax.f32 %v25_v16, 0.0  ;;  %vm914_vm3 = vmmov 0   ;;  %v915_v21 = vmov 0.0   ;;  %v713_v23 = vld [vmem:[%s1111_s2] ss:$0 sm:$0xff] }
   0x8   :  { %v829_v20 = vpack.c.bf16 %v159_v19, %v158_v18  ;;  %786 = vmatprep.mubr.msk.f32.mxu1 %vm914_vm3, %v915_v21  ;;  %v916_v22 = vmov 1.0   ;;  %v350_v42 = vlaneseq  ;;  %vm360_vm4 = vcmask 130048   ;;  %s689_s25 = sshll.u32 %s918_s24, 4  ;;  %s690_s25 = int_to_ptr.vmem [resolvable:$true] %s689_s25 }
   0x9   :  { %827 = vmatpush3.bf16.msra.mxu0 %v824_v7  ;;  %s865_s27 = scalar_lea.vmem %s690_s25, 16  ;;  %s869_s28 = scalar_lea.vmem %s690_s25, 32 }
   0xa   :  { %834 = vmatprep.subr.msk.bf16.mxu0 %vm830_vm2, %v832_v13  ;;  %831 = vmatpush3.bf16.xpose.msk.msra.mxu1 %vm830_vm2, %v829_v20  ;;  %v351_v43 = vshrl.u32 %v350_v42, 7  ;;  %v1032_v7 = vand.u32 127, %v350_v42  ;;  %p866_p0 = scmp.ne.s32.totalorder %s690_s25, %s865_s27  ;;  %p870_p1 = scmp.lt.s32.totalorder %s690_s25, %s690_s25 }
   0xb   :  { %839 = vmatprep.subr.bf16.mxu1 %v832_v13  ;;  %p871_p2 = scmp.lt.s32.totalorder %s869_s28, %s865_s27 }
   0xc   :  { %777 = vmatmul.mubr.msk.f32.vlgmr.msra.gmra.mrb[0].mxu0 %vm41_vm0, %v27_v14  ;;  %v352_v45 = vsub.s32 0, %v351_v43 }
   0xd   :  { %779 = vmatprep.mubr.msk.f32.mxu0 %vm41_vm0, %v28_v15  ;;  %p872_p3 = por %p871_p2, %p870_p1 }
   0xf   :  { %p873_p4 = pnand %p872_p3, %p866_p0 }
  0x10   :  { %780 = vmatmul.mubr.msk.f32.gmra.mrb[2].mxu0 %vm41_vm0, %v29_v17 }
  0x11   :  { %787 = vmatmul.mubr.msk.f32.vlgmr.msra.gmra.mrb[0].mxu1 %vm145_vm1, %v916_v22 }
  0x12   :  { %837 = vmatpush3.bf16.xpose.msk.msra.mxu0 %vm830_vm2, %v832_v13  ;;  %841 = vmatpush3.bf16.msra.mxu1 %v832_v13 }
  0x13   :  { %842 = vmatprep.subr.bf16.mxu1 %v913_v6 }
  0xdf   :  { %v778_v24 = vpop.f32.mrb[0].mxu0 }
  0xe0   :  { %v120_v25 = vpop.f32.mrb[1].mxu0  ;;  %v1000_v26 = vadd.f32 %v778_v24, %v713_v23 }
  0xe1   :  { %v1002_v27 = vadd.f32 %v713_v23, %v120_v25 }
  0xe2   :  { %v142_v34 = vmul.f32 %v1000_v26, %v1000_v26 }
  0xe3   :  { %v781_v28 = vpop.f32.mrb[2].mxu0  ;;  %793 = vmatprep.mubr.msk.f32.mxu0 %vm145_vm1, %v1002_v27  ;;  %v141_v29 = vmul.f32 %v1002_v27, %v1002_v27 }
  0xe4   :  { %v130_v30 = vpop.f32.mrb[3].mxu0  ;;  %794 = vmatmul.mubr.msk.f32.vlgmr.msra.gmra.mrb[4].mxu0 %vm145_vm1, %v1000_v26  ;;  %v1010_v31 = vadd.f32 %v781_v28, %v713_v23  ;;  %v149_v37 = vsel %vm145_vm1, %v142_v34, 0.0  ;;  %v235_v40 = vpop.f32.mrb[0].mxu1 }
  0xe5   :  { %v1012_v32 = vadd.f32 %v713_v23, %v130_v30  ;;  %v146_v33 = vsel %vm145_vm1, %v141_v29, 0.0  ;;  %v788_v41 = vpop.f32.mrb[1].mxu1  ;;  %v353_v50 = vrot.slane %v235_v40, %v352_v45 }
  0xe6   :  { %147 = vadd.xlane.f32.xlu0 %v146_v33  ;;  %v144_v38 = vmul.f32 %v1010_v31, %v1010_v31 }
  0xe7   :  { %796 = vmatprep.mubr.msk.f32.mxu0 %vm145_vm1, %v1012_v32  ;;  %v143_v35 = vmul.f32 %v1012_v32, %v1012_v32 }
  0xe8   :  { %797 = vmatmul.mubr.msk.f32.gmra.mrb[6].mxu0 %vm145_vm1, %v1010_v31  ;;  %v155_v39 = vsel %vm145_vm1, %v144_v38, 0.0 }
  0xe9   :  { %v152_v36 = vsel %vm145_vm1, %v143_v35, 0.0 }
  0xea   :  { %153 = vadd.xlane.f32.xlu1 %v152_v36  ;;  %150 = vadd.xlane.f32.xlu0 %v149_v37 }
  0xee   :  { %156 = vadd.xlane.f32.xlu1 %v155_v39 }
 0x173   :  { %v148_v44 = vpop.xlane.xlu0 %147 }
 0x177   :  { %v154_v46 = vpop.xlane.xlu1 %153  ;;  %v151_v51 = vpop.xlane.xlu0 %150 }
 0x17b   :  { %v157_v59 = vpop.xlane.xlu1 %156 }
 0x1b7   :  { %v795_v47 = vpop.f32.mrb[4].mxu0 }
 0x1b8   :  { %v343_v48 = vmul.f32 2.0, %v795_v47  ;;  %v323_v49 = vpop.f32.mrb[5].mxu0 }
 0x1b9   :  { %v342_v52 = vmul.f32 2.0, %v323_v49 }
 0x1ba   :  { %v347_v53 = vsub.f32 %v151_v51, %v343_v48 }
 0x1bb   :  { %v346_v54 = vsub.f32 %v148_v44, %v342_v52  ;;  %v798_v55 = vpop.f32.mrb[6].mxu0 }
 0x1bc   :  { %v345_v56 = vmul.f32 2.0, %v798_v55  ;;  %v333_v57 = vpop.f32.mrb[7].mxu0  ;;  %v355_v58 = vadd.f32 %v353_v50, %v347_v53 }
 0x1bd   :  { %v344_v60 = vmul.f32 2.0, %v333_v57  ;;  %v354_v61 = vadd.f32 %v353_v50, %v346_v54 }
 0x1be   :  { %v349_v62 = vsub.f32 %v157_v59, %v345_v56  ;;  %v364_v63 = vsel %vm360_vm4, %v355_v58, inf }
 0x1bf   :  { %v348_v0 = vsub.f32 %v154_v46, %v344_v60  ;;  %365 = vmin.xlane.f32.xlu1 %v364_v63  ;;  %v361_v1 = vsel %vm360_vm4, %v354_v61, inf }
 0x1c0   :  { %362 = vmin.xlane.f32.xlu0 %v361_v1  ;;  %v357_v2 = vadd.f32 %v353_v50, %v349_v62 }
 0x1c1   :  { %v356_v3 = vadd.f32 %v353_v50, %v348_v0 }
 0x1c2   :  { %v370_v4 = vsel %vm360_vm4, %v357_v2, inf }
 0x1c3   :  { %371 = vmin.xlane.f32.xlu1 %v370_v4  ;;  %v367_v5 = vsel %vm360_vm4, %v356_v3, inf }
 0x1c4   :  { %368 = vmin.xlane.f32.xlu0 %v367_v5 }
 0x24c   :  { %v366_v8 = vpop.xlane.xlu1 %365 }
 0x24d   :  { %vm374_vm5 = vcmp.le.f32.partialorder %v355_v58, %v366_v8  ;;  %v363_v9 = vpop.xlane.xlu0 %362 }
 0x24e   :  { %v378_v10 = vsel %vm374_vm5, %v1032_v7, 16  ;;  %vm373_vm6 = vcmp.le.f32.partialorder %v354_v61, %v363_v9 }
 0x24f   :  { %v396_v11 = vsel %vm360_vm4, %v378_v10, 2147483647  ;;  %v377_v12 = vsel %vm373_vm6, %v1032_v7, 16  ;;  %v917_v10 = vmov 1.0|1.0  }
 0x250   :  { %v381_v13 = vsel %vm360_vm4, %v377_v12, 2147483647  ;;  %v372_v14 = vpop.xlane.xlu1 %371  ;;  %v398_v15 = vshra.s32 %v396_v11, 16  ;;  %v397_v34 = vand.u32 65535, %v396_v11 }
 0x251   :  { %vm376_vm7 = vcmp.le.f32.partialorder %v357_v2, %v372_v14  ;;  %v369_v16 = vpop.xlane.xlu0 %368  ;;  %v383_v17 = vshra.s32 %v381_v13, 16  ;;  %v382_v35 = vand.u32 65535, %v381_v13 }
 0x252   :  { %v380_v18 = vsel %vm376_vm7, %v1032_v7, 16  ;;  %vm375_vm8 = vcmp.le.f32.partialorder %v356_v3, %v369_v16  ;;  %v400_v19 = vcvt.s32.f32 %v398_v15  ;;  %v399_v37 = vcvt.s32.f32 %v397_v34 }
 0x253   :  { %v426_v20 = vsel %vm360_vm4, %v380_v18, 2147483647  ;;  %v379_v23 = vsel %vm375_vm8, %v1032_v7, 16  ;;  %v385_v24 = vcvt.s32.f32 %v383_v17  ;;  %v384_v40 = vcvt.s32.f32 %v382_v35 }
 0x254   :  { %v411_v25 = vsel %vm360_vm4, %v379_v23, 2147483647  ;;  %401 = vmin.xlane.f32.xlu1 %v400_v19  ;;  %v428_v28 = vshra.s32 %v426_v20, 16  ;;  %v427_v38 = vand.u32 65535, %v426_v20 }
 0x255   :  { %386 = vmin.xlane.f32.xlu0 %v385_v24  ;;  %v413_v29 = vshra.s32 %v411_v25, 16  ;;  %v412_v41 = vand.u32 65535, %v411_v25 }
 0x256   :  { %v430_v30 = vcvt.s32.f32 %v428_v28  ;;  %v429_v45 = vcvt.s32.f32 %v427_v38 }
 0x257   :  { %v415_v33 = vcvt.s32.f32 %v413_v29  ;;  %v414_v47 = vcvt.s32.f32 %v412_v41 }
 0x258   :  { %431 = vmin.xlane.f32.xlu1 %v430_v30 }
 0x259   :  { %416 = vmin.xlane.f32.xlu0 %v415_v33 }
 0x2e1   :  { %v402_v36 = vpop.xlane.xlu1 %401 }
 0x2e2   :  { %v387_v39 = vpop.xlane.xlu0 %386  ;;  %vm403_vm9 = vcmp.eq.f32.partialorder %v400_v19, %v402_v36  ;;  %v408_v50 = vcvt.f32.s32 %v402_v36 }
 0x2e3   :  { %v404_v42 = vsel %vm403_vm9, %v399_v37, inf  ;;  %vm388_vm10 = vcmp.eq.f32.partialorder %v385_v24, %v387_v39  ;;  %v393_v51 = vcvt.f32.s32 %v387_v39 }
 0x2e4   :  { %405 = vmin.xlane.f32.xlu1 %v404_v42  ;;  %v389_v43 = vsel %vm388_vm10, %v384_v40, inf  ;;  %v409_v53 = vshll.u32 %v408_v50, 16 }
 0x2e5   :  { %v432_v44 = vpop.xlane.xlu1 %431  ;;  %390 = vmin.xlane.f32.xlu0 %v389_v43  ;;  %v394_v57 = vshll.u32 %v393_v51, 16 }
 0x2e6   :  { %v417_v46 = vpop.xlane.xlu0 %416  ;;  %vm433_vm11 = vcmp.eq.f32.partialorder %v430_v30, %v432_v44  ;;  %v438_v54 = vcvt.f32.s32 %v432_v44 }
 0x2e7   :  { %v434_v48 = vsel %vm433_vm11, %v429_v45, inf  ;;  %vm418_vm12 = vcmp.eq.f32.partialorder %v415_v33, %v417_v46  ;;  %v423_v58 = vcvt.f32.s32 %v417_v46 }
 0x2e8   :  { %435 = vmin.xlane.f32.xlu1 %v434_v48  ;;  %v419_v49 = vsel %vm418_vm12, %v414_v47, inf  ;;  %v439_v63 = vshll.u32 %v438_v54, 16 }
 0x2e9   :  { %420 = vmin.xlane.f32.xlu0 %v419_v49  ;;  %v424_v2 = vshll.u32 %v423_v58, 16 }
 0x371   :  { %v406_v52 = vpop.xlane.xlu1 %405 }
 0x372   :  { %v407_v55 = vcvt.f32.s32 %v406_v52  ;;  %v391_v56 = vpop.xlane.xlu0 %390 }
 0x373   :  { %v392_v59 = vcvt.f32.s32 %v391_v56 }
 0x374   :  { %v410_v60 = vadd.s32 %v409_v53, %v407_v55 }
 0x375   :  { %v395_v61 = vadd.s32 %v394_v57, %v392_v59  ;;  %v436_v62 = vpop.xlane.xlu1 %435 }
 0x376   :  { %vm442_vm13 = vcmp.eq.s32.totalorder %v1032_v7, %v410_v60  ;;  %v437_v0 = vcvt.f32.s32 %v436_v62  ;;  %v421_v1 = vpop.xlane.xlu0 %420 }
 0x377   :  { %v422_v3 = vcvt.f32.s32 %v421_v1  ;;  %vm441_vm14 = vcmp.eq.s32.totalorder %v1032_v7, %v395_v61  ;;  %v728_v8 = vsel %vm442_vm13, 1.0, %v915_v21 }
 0x378   :  { %v440_v4 = vadd.s32 %v439_v63, %v437_v0  ;;  %v727_v5 = vsel %vm441_vm14, 1.0, %v915_v21  ;;  %vm843_vm15 = vmpackc.low %vm442_vm13, %vm441_vm14 }
 0x379   :  { %v425_v9 = vadd.s32 %v424_v2, %v422_v3  ;;  %803 = vmatprep.mubr.msk.f32.mxu1 %vm360_vm4, %v727_v5 }
 0x37a   :  { %804 = vmatmul.mubr.msk.f32.vlgmr.msra.gmra.mrb[2].mxu1 %vm360_vm4, %v728_v8  ;;  %vm444_vm2 = vcmp.eq.s32.totalorder %v1032_v7, %v440_v4 }
 0x37b   :  { %844 = vmatpush3.bf16.msk.msra.mxu1 %vm843_vm15, %v917_v10  ;;  %vm443_vm5 = vcmp.eq.s32.totalorder %v1032_v7, %v425_v9  ;;  %v730_v12 = vsel %vm444_vm2, 1.0, %v915_v21 }
 0x37c   :  { %v729_v11 = vsel %vm443_vm5, 1.0, %v915_v21  ;;  %845 = vmatprep.subr.bf16.mxu1 %v913_v6  ;;  %vm846_vm6 = vmpackc.low %vm444_vm2, %vm443_vm5 }
 0x37d   :  { %806 = vmatprep.mubr.msk.f32.mxu1 %vm360_vm4, %v729_v11 }
 0x37e   :  { %807 = vmatmul.mubr.msk.f32.gmra.mrb[4].mxu1 %vm360_vm4, %v730_v12 }
 0x37f   :  { %847 = vmatpush3.bf16.msk.msra.mxu1 %vm846_vm6, %v917_v10  ;;  %817 = vmatprep.mubr.msk.f32.mxu1 %vm914_vm3, %v915_v21 }
 0x382   :  { %818 = vmatmul.mubr.msk.f32.vlgmr.msra.gmra.mrb[6].mxu1 %vm41_vm0, %v916_v22  ;;  %vm663_vm0 = vcmask 122880  }
 0x44d   :  { %v805_v13 = vpop.f32.mrb[2].mxu1 }
 0x44e   :  { %551 = vst.msk [vmem:[%s1113_s4 + $0x8] sm:$0xff] %vm145_vm1, %v805_v13  ;;  %v555_v6 = vsub.f32 %v805_v13, %v1000_v26  ;;  %v531_v7 = vpop.f32.mrb[3].mxu1 }
 0x44f   :  { %550 = vst.msk [vmem:[%s1113_s4] sm:$0xff] %vm145_vm1, %v531_v7  ;;  %v554_v14 = vsub.f32 %v531_v7, %v1002_v27 }
 0x450   :  { %v559_v21 = vmul.f32 %v555_v6, %v555_v6 }
 0x451   :  { %v558_v15 = vmul.f32 %v554_v14, %v554_v14  ;;  %v808_v16 = vpop.f32.mrb[4].mxu1 }
 0x452   :  { %v563_v22 = vsel %vm145_vm1, %v559_v21, 0.0  ;;  %553 = vst.msk [vmem:[%s1113_s4 + $0x18] sm:$0xff] %vm145_vm1, %v808_v16  ;;  %v557_v26 = vsub.f32 %v808_v16, %v1010_v31  ;;  %v541_v17 = vpop.f32.mrb[5].mxu1 }
 0x453   :  { %v562_v18 = vsel %vm145_vm1, %v558_v15, 0.0  ;;  %552 = vst.msk [vmem:[%s1113_s4 + $0x10] sm:$0xff] %vm145_vm1, %v541_v17  ;;  %v556_v27 = vsub.f32 %v541_v17, %v1012_v32 }
 0x454   :  { %v564_v19 = vadd.f32 %v563_v22, %v562_v18  ;;  %v561_v20 = vmul.f32 %v557_v26, %v557_v26 }
 0x455   :  { %v560_v23 = vmul.f32 %v556_v27, %v556_v27  ;;  %v653_v24 = vpop.f32.mrb[6].mxu1 }
 0x456   :  { %v658_v25 = vmul.f32 0.03125, %v653_v24  ;;  %v819_v28 = vpop.f32.mrb[7].mxu1  ;;  %v567_v33 = vsel %vm145_vm1, %v561_v20, 0.0 }
 0x457   :  { %v565_v29 = vsel %vm145_vm1, %v560_v23, 0.0  ;;  %vm583_vm1 = vcmask 0  }
 0x458   :  { %v659_v30 = vadd.f32 1e-10, %v658_v25  ;;  %v566_v31 = vadd.f32 %v565_v29, %v564_v19 }
 0x45a   :  { %861 = vlog2.f32 %v659_v30  ;;  %v568_v34 = vadd.f32 %v567_v33, %v566_v31 }
 0x45c   :  { %569 = vadd.xlane.f32.xlu0 %v568_v34 }
 0x464   :  { %v862_v35 = vpop.eup %861 }
 0x465   :  { %v661_v36 = vmul.f32 0.6931472, %v862_v35 }
 0x467   :  { %v662_v37 = vmul.f32 %v661_v36, %v658_v25 }
 0x469   :  { %v664_v32 = vsel %vm663_vm0, %v662_v37, 0.0 }
 0x46a   :  { %665 = vadd.xlane.f32.xlu1 %v664_v32 }
 0x4e9   :  { %v570_v38 = vpop.xlane.xlu0 %569 }
 0x4ea   :  { %v571_v39 = vrot.slane %v570_v38, 4 }
 0x4ec   :  { %v572_v40 = vadd.f32 %v571_v39, %v570_v38 }
 0x4ee   :  { %v573_v41 = vrot.slane %v572_v40, 2 }
 0x4f0   :  { %v574_v42 = vadd.f32 %v573_v41, %v572_v40 }
 0x4f2   :  { %v575_v43 = vrot.slane %v574_v42, 1 }
 0x4f4   :  { %v576_v44 = vadd.f32 %v575_v43, %v574_v42 }
 0x4f6   :  { %848 = vpush %v576_v44 }
 0x4f7   :  { %v666_v45 = vpop.xlane.xlu1 %665 }
 0x4f8   :  { %v667_v46 = vrot.slane %v666_v45, 4 }
 0x4fa   :  { %v668_v47 = vadd.f32 %v667_v46, %v666_v45 }
 0x4fc   :  { %v669_v48 = vrot.slane %v668_v47, 2 }
 0x4fe   :  { %v670_v49 = vadd.f32 %v669_v48, %v668_v47 }
 0x500   :  { %v671_v50 = vrot.slane %v670_v49, 1 }
 0x502   :  { %v672_v51 = vadd.f32 %v671_v50, %v670_v49 }
 0x504   :  { %850 = vpush %v672_v51 }
 0x527   :  { %s849_s4 = spop %848 }
 0x528   :  { %s580_s23 = smul.f32 0.00390625, %s849_s4 }
 0x52a   :  { %s581_s26 = smul.f32 1.25, %s580_s23 }
 0x52c   :  { %v582_v52 = vstv %s581_s26 }
 0x52d   :  { %584 = vst.msk [vmem:[#allocation2] sm:$0x1] %vm583_vm1, %v582_v52 }
 0x52e   :  { %876 = shalt.err (!%p873_p4)
}
 0x52f   :  { %s877_s7 = scalar_lea.hbm %s1114_s5, 16 }
 0x530   :  { %p878_p5 = scmp.ne.s32.totalorder %s1114_s5, %s877_s7  ;;  %p881_p6 = scmp.lt.u32.totalorder %s877_s7, %s1114_s5 }
 0x532   :  { %p883_p7 = pnand %p881_p6, %p878_p5 }
 0x534   :  { %886 = shalt.err (!%p883_p7)
}
 0x535   :  { %692 = dma.vmem_to_hbm [thread:$0]  %s690_s25, 16, %s1114_s5, [#allocation3]  }
 0x536   :  { %s851_s13 = spop %850  ;;  %s919_s14 = smov [#allocation4]  }
 0x537   :  { %s674_s3 = ssub.f32 0.0, %s851_s13  ;;  %s699_s0 = sshll.u32 %s919_s14, 4  ;;  %s700_s0 = int_to_ptr.vmem [resolvable:$true] %s699_s0 }
 0x538   :  { %s887_s2 = scalar_lea.vmem %s700_s0, 16  ;;  %s891_s16 = scalar_lea.vmem %s700_s0, 32 }
 0x539   :  { %v675_v53 = vstv %s674_s3  ;;  %p888_p8 = scmp.ne.s32.totalorder %s700_s0, %s887_s2  ;;  %p892_p9 = scmp.lt.s32.totalorder %s700_s0, %s700_s0 }
 0x53a   :  { %v676_v54 = vmul.f32 1.442695, %v675_v53  ;;  %p893_p10 = scmp.lt.s32.totalorder %s891_s16, %s887_s2 }
 0x53c   :  { %863 = vpow2.f32 %v676_v54  ;;  %p894_p11 = por %p893_p10, %p892_p9 }
 0x53e   :  { %p895_p12 = pnand %p894_p11, %p888_p8 }
 0x546   :  { %v864_v55 = vpop.eup %863 }
 0x547   :  { %852 = vpush %v864_v55 }
 0x578   :  { %s853_s15 = spop %852 }
 0x579   :  { %v679_v56 = vstv %s853_s15 }
 0x57a   :  { %680 = vst.msk [vmem:[#allocation4] sm:$0x1] %vm583_vm1, %v679_v56 }
 0x57b   :  { %898 = shalt.err (!%p895_p12)
}
 0x57c   :  { %s899_s18 = scalar_lea.hbm %s1115_s6, 16 }
 0x57d   :  { %p900_p13 = scmp.ne.s32.totalorder %s1115_s6, %s899_s18  ;;  %p903_p0 = scmp.lt.u32.totalorder %s899_s18, %s1115_s6 }
 0x57f   :  { %p905_p1 = pnand %p903_p0, %p900_p13 }
 0x581   :  { %908 = shalt.err (!%p905_p1)
}
 0x582   :  { %702 = dma.vmem_to_hbm [thread:$0]  %s700_s0, 16, %s1115_s6, [#allocation5]  }
 0x583   :  { %909 = dma.done.wait [#allocation3], 16  }
 0x584   :  { %910 = vsyncadd [#allocation3], 4294967280 }
 0x585   :  { %911 = dma.done.wait [#allocation5], 16  }
 0x586   :  { %912 = vsyncadd [#allocation5], 4294967280 }
 0x587   :  { %711 = vsyncpa [#allocation3], 1 }
 0x588   :  { %712 = vsyncpa [#allocation5], 1 }

// kernel: tile.13
= control target key start
LH: loop header
LB: loop body
LE: loop exit
PB: predicated region body
PF: predicated region fallthrough
CT: control target
= control target key end

     0   :  { %s22_s0 = inlined_call_operand.vmem [shape: f32[16], index: 0, kind: input, shape index: {}]   ;;  %s23_s1 = inlined_call_operand.vmem [shape: f32[4,16], index: 1, kind: output, shape index: {}]  }
   0x1   :  { %v4_v0 = vld [vmem:[%s22_s0] ss:$0 sm:$0xff] }
   0x2   :  { %5 = vst [vmem:[%s23_s1] sm:$0xf] %v4_v0 }

// kernel: tile.14
= control target key start
LH: loop header
LB: loop body
LE: loop exit
PB: predicated region body
PF: predicated region fallthrough
CT: control target
= control target key end

     0   :  { %vm7_vm0 = vcmask 130048   ;;  %s37_s8 = smov 16   ;;  %s38_s9 = smov 32   ;;  %vm13_vm1 = vcmask 523648   ;;  %vm19_vm2 = vcmask 392448   ;;  %vm25_vm3 = vcmask 261248   ;;  %s55_s0 = inlined_call_operand.vmem [shape: f32[4,16], index: 0, kind: input, shape index: {}]   ;;  %s56_s1 = inlined_call_operand.vmem [shape: f32[1,64], index: 1, kind: output, shape index: {}]  }
   0x1   :  { %v4_v0 = vld [vmem:[%s55_s0] sm:$0xf]  ;;  %s36_s0 = smov 48  }
   0x2   :  { %5 = vst [vmem:[#allocation1] sm:$0xf] %v4_v0 }
   0x9   :  { %v10_v1 = vld [vmem:[#allocation1 + $0x3] sm:$0x1]   ;;  %v22_v2 = vld [vmem:[#allocation1 + $0x1] sm:$0x1]   ;;  %v6_v3 = vld [vmem:[#allocation1] sm:$0x1]  }
   0xa   :  { %11 = vrot.lane.b32.xlu0 %v10_v1, %s36_s0  ;;  %23 = vrot.lane.b32.xlu1 %v22_v2, %s37_s8  ;;  %v16_v4 = vld [vmem:[#allocation1 + $0x2] sm:$0x1]   ;;  %8 = vst.msk [vmem:[#allocation0] sm:$0x1] %vm7_vm0, %v6_v3  }
   0xe   :  { %17 = vrot.lane.b32.xlu0 %v16_v4, %s38_s9 }
  0x7c   :  { %v12_v5 = vpop.permute.xlu0 %11   ;;  %v24_v6 = vpop.permute.xlu1 %23  }
  0x7d   :  { %14 = vst.msk [vmem:[#allocation0] sm:$0x1] %vm13_vm1, %v12_v5  }
  0x80   :  { %v18_v7 = vpop.permute.xlu0 %17  }
  0x81   :  { %20 = vst.msk [vmem:[#allocation0] sm:$0x1] %vm19_vm2, %v18_v7  }
  0x82   :  { %26 = vst.msk [vmem:[#allocation0] sm:$0x1] %vm25_vm3, %v24_v6  }
  0x89   :  { %v30_v8 = vld [vmem:[#allocation0] sm:$0x1] }
  0x8a   :  { %32 = vst [vmem:[%s56_s1] sm:$0x1] %v30_v8 }

// kernel: model_forward.20
= control target key start
LH: loop header
LB: loop body
LE: loop exit
PB: predicated region body
PF: predicated region fallthrough
CT: control target
= control target key end

     0   :  { %vm81_vm0 = vcmask 261120   ;;  %vm268_vm1 = vcmask 523264   ;;  %s575_s1 = inlined_call_operand.vmem [shape: f32[288,64], index: 1, kind: input, shape index: {}]   ;;  %s576_s0 = inlined_call_operand.vmem [shape: f32[32,288], index: 0, kind: input, shape index: {}]   ;;  %s577_s2 = inlined_call_operand.vmem [shape: f32[1,64], index: 2, kind: input, shape index: {}]   ;;  %s578_s3 = inlined_call_operand.vmem [shape: f32[32,64], index: 3, kind: output, shape index: {}]  }
   0x1   :  { %v54_v0 = vld [vmem:[%s575_s1 + $0x80] sm:$0xff]  ;;  %v55_v1 = vld [vmem:[%s575_s1 + $0x88] sm:$0xff]  ;;  %v56_v5 = vld [vmem:[%s575_s1 + $0x90] sm:$0xff] }
   0x2   :  { %v38_v2 = vld [vmem:[%s575_s1] sm:$0xff]  ;;  %v348_v3 = vpack.c.bf16 %v55_v1, %v54_v0  ;;  %v39_v4 = vld [vmem:[%s575_s1 + $0x8] sm:$0xff]  ;;  %v57_v6 = vld [vmem:[%s575_s1 + $0x98] sm:$0xff] }
   0x3   :  { %v350_v7 = vpack.c.bf16 %v39_v4, %v38_v2  ;;  %v352_v8 = vpack.c.bf16 %v57_v6, %v56_v5  ;;  %v40_v9 = vld [vmem:[%s575_s1 + $0x10] sm:$0xff]  ;;  %v41_v10 = vld [vmem:[%s575_s1 + $0x18] sm:$0xff]  ;;  %v58_v11 = vld [vmem:[%s575_s1 + $0xa0] sm:$0xff] }
   0x4   :  { %349 = vmatprep.subr.bf16.mxu0 %v348_v3  ;;  %v59_v12 = vld [vmem:[%s575_s1 + $0xa8] sm:$0xff]  ;;  %v354_v13 = vpack.c.bf16 %v41_v10, %v40_v9  ;;  %v42_v15 = vld [vmem:[%s575_s1 + $0x20] sm:$0xff]  ;;  %v60_v17 = vld [vmem:[%s575_s1 + $0xb0] sm:$0xff] }
   0x5   :  { %351 = vmatpush3.bf16.msra.mxu0 %v350_v7  ;;  %v356_v14 = vpack.c.bf16 %v59_v12, %v58_v11  ;;  %v43_v16 = vld [vmem:[%s575_s1 + $0x28] sm:$0xff]  ;;  %v61_v18 = vld [vmem:[%s575_s1 + $0xb8] sm:$0xff]  ;;  %v44_v21 = vld [vmem:[%s575_s1 + $0x30] sm:$0xff] }
   0x6   :  { %353 = vmatprep.subr.bf16.mxu0 %v352_v8  ;;  %v358_v19 = vpack.c.bf16 %v43_v16, %v42_v15  ;;  %v360_v20 = vpack.c.bf16 %v61_v18, %v60_v17  ;;  %v45_v22 = vld [vmem:[%s575_s1 + $0x38] sm:$0xff]  ;;  %v62_v23 = vld [vmem:[%s575_s1 + $0xc0] sm:$0xff]  ;;  %v63_v24 = vld [vmem:[%s575_s1 + $0xc8] sm:$0xff] }
   0x7   :  { %v70_v25 = vld [vmem:[%s575_s1 + $0x100] sm:$0xff]  ;;  %v71_v26 = vld [vmem:[%s575_s1 + $0x108] sm:$0xff]  ;;  %v362_v29 = vpack.c.bf16 %v45_v22, %v44_v21  ;;  %v72_v31 = vld [vmem:[%s575_s1 + $0x110] sm:$0xff]  ;;  %v364_v33 = vpack.c.bf16 %v63_v24, %v62_v23 }
   0x8   :  { %v380_v27 = vpack.c.bf16 %v71_v26, %v70_v25  ;;  %v15_v28 = vld [vmem:[%s576_s0 + $0x8] sm:$0xff]  ;;  %v73_v32 = vld [vmem:[%s575_s1 + $0x118] sm:$0xff]  ;;  %v46_v34 = vld [vmem:[%s575_s1 + $0x40] sm:$0xff] }
   0x9   :  { %355 = vmatpush3.bf16.msra.mxu0 %v354_v13  ;;  %v27_v30 = vmax.f32 %v15_v28, 0.0  ;;  %v47_v35 = vld [vmem:[%s575_s1 + $0x48] sm:$0xff]  ;;  %v384_v36 = vpack.c.bf16 %v73_v32, %v72_v31  ;;  %v16_v37 = vld [vmem:[%s576_s0 + $0x10] sm:$0xff]  ;;  %v65_v39 = vld [vmem:[%s575_s1 + $0xd8] sm:$0xff] }
   0xa   :  { %357 = vmatprep.subr.bf16.mxu0 %v356_v14  ;;  %381 = vmatprep.subr.bf16.mxu1 %v380_v27  ;;  %v64_v38 = vld [vmem:[%s575_s1 + $0xd0] sm:$0xff]  ;;  %v28_v40 = vmax.f32 %v16_v37, 0.0  ;;  %v19_v41 = vld [vmem:[%s576_s0 + $0x28] sm:$0xff]  ;;  %v22_v42 = vld [vmem:[%s576_s0 + $0x40] sm:$0xff]  ;;  %v366_v43 = vpack.c.bf16 %v47_v35, %v46_v34 }
   0xb   :  { %383 = vmatpush3.bf16.msra.mxu1 %v380_v27  ;;  %158 = vmatprep.mubr.f32.mxu0 %v27_v30  ;;  %v368_v44 = vpack.c.bf16 %v65_v39, %v64_v38  ;;  %v48_v45 = vld [vmem:[%s575_s1 + $0x50] sm:$0xff]  ;;  %v49_v46 = vld [vmem:[%s575_s1 + $0x58] sm:$0xff]  ;;  %v31_v47 = vmax.f32 %v19_v41, 0.0  ;;  %v66_v48 = vld [vmem:[%s575_s1 + $0xe0] sm:$0xff]  ;;  %v34_v50 = vmax.f32 %v22_v42, 0.0 }
   0xc   :  { %385 = vmatprep.subr.bf16.mxu1 %v384_v36  ;;  %342 = vmatprep.mubr.msk.f32.mxu1 %vm81_vm0, %v28_v40  ;;  %v67_v49 = vld [vmem:[%s575_s1 + $0xe8] sm:$0xff]  ;;  %v25_v51 = vld [vmem:[%s576_s0 + $0x58] sm:$0xff]  ;;  %v370_v52 = vpack.c.bf16 %v49_v46, %v48_v45  ;;  %v50_v54 = vld [vmem:[%s575_s1 + $0x60] sm:$0xff] }
   0xd   :  { %359 = vmatpush3.bf16.msra.mxu0 %v358_v19  ;;  %v372_v53 = vpack.c.bf16 %v67_v49, %v66_v48  ;;  %v51_v55 = vld [vmem:[%s575_s1 + $0x68] sm:$0xff]  ;;  %v37_v56 = vmax.f32 %v25_v51, 0.0  ;;  %v68_v57 = vld [vmem:[%s575_s1 + $0xf0] sm:$0xff]  ;;  %v69_v58 = vld [vmem:[%s575_s1 + $0xf8] sm:$0xff] }
   0xe   :  { %361 = vmatprep.subr.bf16.mxu0 %v360_v20  ;;  %v374_v59 = vpack.c.bf16 %v51_v55, %v50_v54  ;;  %v376_v60 = vpack.c.bf16 %v69_v58, %v68_v57  ;;  %v52_v61 = vld [vmem:[%s575_s1 + $0x70] sm:$0xff]  ;;  %v53_v62 = vld [vmem:[%s575_s1 + $0x78] sm:$0xff]  ;;  %v14_v0 = vld [vmem:[%s576_s0] sm:$0xff] }
   0xf   :  { %387 = vmatpush3.bf16.msra.mxu1 %v384_v36  ;;  %v378_v63 = vpack.c.bf16 %v53_v62, %v52_v61  ;;  %v18_v1 = vld [vmem:[%s576_s0 + $0x20] sm:$0xff]  ;;  %v26_v2 = vmax.f32 %v14_v0, 0.0  ;;  %v17_v4 = vld [vmem:[%s576_s0 + $0x18] sm:$0xff]  ;;  %v20_v8 = vld [vmem:[%s576_s0 + $0x30] sm:$0xff] }
  0x10   :  { %v30_v3 = vmax.f32 %v18_v1, 0.0  ;;  %v21_v5 = vld [vmem:[%s576_s0 + $0x38] sm:$0xff]  ;;  %v29_v6 = vmax.f32 %v17_v4, 0.0  ;;  %v24_v9 = vld [vmem:[%s576_s0 + $0x50] sm:$0xff]  ;;  %v32_v10 = vmax.f32 %v20_v8, 0.0  ;;  %v23_v12 = vld [vmem:[%s576_s0 + $0x48] sm:$0xff] }
  0x11   :  { %363 = vmatpush3.bf16.msra.mxu0 %v362_v29  ;;  %v33_v7 = vmax.f32 %v21_v5, 0.0  ;;  %v36_v11 = vmax.f32 %v24_v9, 0.0  ;;  %v35_v13 = vmax.f32 %v23_v12, 0.0  ;;  %v277_v20 = vld [vmem:[%s577_s2] ss:$0 sm:$0xff] }
  0x12   :  { %365 = vmatprep.subr.bf16.mxu0 %v364_v33  ;;  %343 = vmatmul.mubr.msk.f32.vlgmr.msra.gmra.mrb[0].mxu1 %vm81_vm0, %v31_v47 }
  0x13   :  { %345 = vmatprep.mubr.msk.f32.mxu1 %vm81_vm0, %v34_v50 }
  0x15   :  { %367 = vmatpush3.bf16.msra.mxu0 %v366_v43 }
  0x16   :  { %369 = vmatprep.subr.bf16.mxu0 %v368_v44  ;;  %346 = vmatmul.mubr.msk.f32.gmra.mrb[2].mxu1 %vm81_vm0, %v37_v56 }
  0x19   :  { %371 = vmatpush3.bf16.msra.mxu0 %v370_v52 }
  0x1a   :  { %373 = vmatprep.subr.bf16.mxu0 %v372_v53 }
  0x1d   :  { %375 = vmatpush3.bf16.msra.mxu0 %v374_v59 }
  0x1e   :  { %377 = vmatprep.subr.bf16.mxu0 %v376_v60 }
  0x21   :  { %379 = vmatpush3.bf16.msra.mxu0 %v378_v63 }
  0x24   :  { %159 = vmatmul.mubr.f32.vlgmr.msra.gmra.mrb[0].mxu0 %v26_v2 }
  0x25   :  { %163 = vmatprep.mubr.f32.mxu0 %v30_v3 }
  0x28   :  { %164 = vmatmul.mubr.f32.gmra.mrb[2].mxu0 %v29_v6 }
  0x29   :  { %168 = vmatprep.mubr.f32.mxu0 %v33_v7 }
  0x2c   :  { %169 = vmatmul.mubr.f32.gmra.mrb[4].mxu0 %v32_v10 }
  0x2d   :  { %173 = vmatprep.mubr.f32.mxu0 %v36_v11 }
  0x30   :  { %174 = vmatmul.mubr.f32.gmra.mrb[6].mxu0 %v35_v13 }
  0xe5   :  { %v344_v14 = vpop.f32.mrb[0].mxu1 }
  0xe6   :  { %v245_v15 = vpop.f32.mrb[1].mxu1 }
  0xe9   :  { %v347_v16 = vpop.f32.mrb[2].mxu1 }
  0xea   :  { %v255_v17 = vpop.f32.mrb[3].mxu1 }
  0xf7   :  { %v314_v18 = vpop.f32.mrb[0].mxu0 }
  0xf8   :  { %v315_v19 = vpop.f32.mrb[1].mxu0 }
  0xf9   :  { %v316_v21 = vadd.f32 %v315_v19, %v314_v18 }
  0xfb   :  { %v317_v22 = vpop.f32.mrb[2].mxu0  ;;  %v161_v23 = vadd.f32 %v316_v21, %v277_v20 }
  0xfc   :  { %v318_v24 = vpop.f32.mrb[3].mxu0 }
  0xfd   :  { %v319_v25 = vadd.f32 %v318_v24, %v317_v22  ;;  %v246_v26 = vadd.f32 %v245_v15, %v161_v23 }
  0xff   :  { %v166_v27 = vadd.f32 %v319_v25, %v277_v20  ;;  %v264_v28 = vmax.f32 %v246_v26, 0.0  ;;  %v320_v29 = vpop.f32.mrb[4].mxu0 }
 0x100   :  { %v321_v30 = vpop.f32.mrb[5].mxu0 }
 0x101   :  { %v251_v31 = vadd.f32 %v344_v14, %v166_v27  ;;  %269 = vst.msk [vmem:[%s578_s3] sm:$0xff] %vm268_vm1, %v264_v28  ;;  %v322_v32 = vadd.f32 %v321_v30, %v320_v29 }
 0x103   :  { %v265_v33 = vmax.f32 %v251_v31, 0.0  ;;  %v323_v34 = vpop.f32.mrb[6].mxu0  ;;  %v171_v35 = vadd.f32 %v322_v32, %v277_v20 }
 0x104   :  { %v324_v36 = vpop.f32.mrb[7].mxu0 }
 0x105   :  { %270 = vst.msk [vmem:[%s578_s3 + $0x8] sm:$0xff] %vm268_vm1, %v265_v33  ;;  %v325_v37 = vadd.f32 %v324_v36, %v323_v34  ;;  %v256_v38 = vadd.f32 %v255_v17, %v171_v35 }
 0x107   :  { %v176_v39 = vadd.f32 %v325_v37, %v277_v20  ;;  %v266_v40 = vmax.f32 %v256_v38, 0.0 }
 0x109   :  { %v261_v41 = vadd.f32 %v347_v16, %v176_v39  ;;  %271 = vst.msk [vmem:[%s578_s3 + $0x10] sm:$0xff] %vm268_vm1, %v266_v40 }
 0x10b   :  { %v267_v42 = vmax.f32 %v261_v41, 0.0 }
 0x10d   :  { %272 = vst.msk [vmem:[%s578_s3 + $0x18] sm:$0xff] %vm268_vm1, %v267_v42 }

// kernel: model_forward.21
= control target key start
LH: loop header
LB: loop body
LE: loop exit
PB: predicated region body
PF: predicated region fallthrough
CT: control target
= control target key end

     0   :  { %v349_v0 = vmov 0.0|0.0   ;;  %vm71_vm0 = vcmask 130048   ;;  %vm265_vm1 = vcmask 31744   ;;  %s621_s1 = inlined_call_operand.vmem [shape: f32[144,4], index: 1, kind: input, shape index: {}]   ;;  %s622_s0 = inlined_call_operand.vmem [shape: f32[128,144], index: 0, kind: input, shape index: {}]   ;;  %s623_s2 = inlined_call_operand.vmem [shape: f32[1,4], index: 2, kind: input, shape index: {}]   ;;  %s624_s3 = inlined_call_operand.vmem [shape: f32[128,4], index: 3, kind: output, shape index: {}]  }
   0x1   :  { %303 = vmatprep.subr.bf16.mxu0 %v349_v0  ;;  %330 = vmatprep.subr.bf16.mxu1 %v349_v0  ;;  %v46_v1 = vld [vmem:[%s621_s1] sm:$0xff]  ;;  %v47_v2 = vld [vmem:[%s621_s1 + $0x8] sm:$0xff]  ;;  %v48_v3 = vld [vmem:[%s621_s1 + $0x10] sm:$0xff] }
   0x2   :  { %v304_v4 = vpack.c.bf16 %v47_v2, %v46_v1  ;;  %v49_v5 = vld [vmem:[%s621_s1 + $0x18] sm:$0xff]  ;;  %v50_v7 = vld [vmem:[%s621_s1 + $0x20] sm:$0xff]  ;;  %v51_v8 = vld [vmem:[%s621_s1 + $0x28] sm:$0xff] }
   0x3   :  { %v307_v6 = vpack.c.bf16 %v49_v5, %v48_v3  ;;  %v15_v9 = vld [vmem:[%s622_s0 + $0x8] sm:$0xff]  ;;  %v310_v11 = vpack.c.bf16 %v51_v8, %v50_v7  ;;  %v52_v12 = vld [vmem:[%s621_s1 + $0x30] sm:$0xff]  ;;  %v53_v13 = vld [vmem:[%s621_s1 + $0x38] sm:$0xff] }
   0x4   :  { %305 = vmatpush1.bf16.msra.mxu0 %v304_v4  ;;  %339 = vmatpush1.bf16.msra.mxu1 %v304_v4  ;;  %v31_v10 = vld [vmem:[%s622_s0 + $0x88] sm:$0xff]  ;;  %v313_v14 = vpack.c.bf16 %v53_v13, %v52_v12  ;;  %v54_v15 = vld [vmem:[%s621_s1 + $0x40] sm:$0xff]  ;;  %v56_v18 = vld [vmem:[%s621_s1 + $0x50] sm:$0xff] }
   0x5   :  { %306 = vmatprep.subr.bf16.mxu0 %v349_v0  ;;  %331 = vmatprep.subr.bf16.mxu1 %v349_v0  ;;  %v55_v16 = vld [vmem:[%s621_s1 + $0x48] sm:$0xff]  ;;  %v57_v19 = vld [vmem:[%s621_s1 + $0x58] sm:$0xff]  ;;  %v58_v21 = vld [vmem:[%s621_s1 + $0x60] sm:$0xff] }
   0x6   :  { %287 = vmatprep.mubr.msk.f32.mxu0 %vm71_vm0, %v15_v9  ;;  %295 = vmatprep.mubr.msk.f32.mxu1 %vm71_vm0, %v31_v10  ;;  %v316_v17 = vpack.c.bf16 %v55_v16, %v54_v15  ;;  %v319_v20 = vpack.c.bf16 %v57_v19, %v56_v18  ;;  %v59_v22 = vld [vmem:[%s621_s1 + $0x68] sm:$0xff]  ;;  %v60_v24 = vld [vmem:[%s621_s1 + $0x70] sm:$0xff]  ;;  %v61_v25 = vld [vmem:[%s621_s1 + $0x78] sm:$0xff] }
   0x7   :  { %v322_v23 = vpack.c.bf16 %v59_v22, %v58_v21  ;;  %v325_v26 = vpack.c.bf16 %v61_v25, %v60_v24  ;;  %v62_v27 = vld [vmem:[%s621_s1 + $0x80] sm:$0xff]  ;;  %v63_v28 = vld [vmem:[%s621_s1 + $0x88] sm:$0xff]  ;;  %v17_v32 = vld [vmem:[%s622_s0 + $0x18] sm:$0xff] }
   0x8   :  { %308 = vmatpush1.bf16.msra.mxu0 %v307_v6  ;;  %340 = vmatpush1.bf16.msra.mxu1 %v307_v6  ;;  %v328_v29 = vpack.c.bf16 %v63_v28, %v62_v27  ;;  %v14_v30 = vld [vmem:[%s622_s0] sm:$0xff]  ;;  %v33_v33 = vld [vmem:[%s622_s0 + $0x98] sm:$0xff]  ;;  %v16_v34 = vld [vmem:[%s622_s0 + $0x10] sm:$0xff] }
   0x9   :  { %309 = vmatprep.subr.bf16.mxu0 %v349_v0  ;;  %332 = vmatprep.subr.bf16.mxu1 %v349_v0  ;;  %v30_v31 = vld [vmem:[%s622_s0 + $0x80] sm:$0xff]  ;;  %v32_v35 = vld [vmem:[%s622_s0 + $0x90] sm:$0xff]  ;;  %v19_v36 = vld [vmem:[%s622_s0 + $0x28] sm:$0xff] }
   0xa   :  { %v35_v37 = vld [vmem:[%s622_s0 + $0xa8] sm:$0xff]  ;;  %v18_v38 = vld [vmem:[%s622_s0 + $0x20] sm:$0xff]  ;;  %v21_v40 = vld [vmem:[%s622_s0 + $0x38] sm:$0xff] }
   0xb   :  { %v34_v39 = vld [vmem:[%s622_s0 + $0xa0] sm:$0xff]  ;;  %v37_v41 = vld [vmem:[%s622_s0 + $0xb8] sm:$0xff]  ;;  %v20_v42 = vld [vmem:[%s622_s0 + $0x30] sm:$0xff] }
   0xc   :  { %311 = vmatpush1.bf16.msra.mxu0 %v310_v11  ;;  %341 = vmatpush1.bf16.msra.mxu1 %v310_v11  ;;  %v36_v43 = vld [vmem:[%s622_s0 + $0xb0] sm:$0xff]  ;;  %v23_v44 = vld [vmem:[%s622_s0 + $0x48] sm:$0xff]  ;;  %v22_v46 = vld [vmem:[%s622_s0 + $0x40] sm:$0xff] }
   0xd   :  { %312 = vmatprep.subr.bf16.mxu0 %v349_v0  ;;  %333 = vmatprep.subr.bf16.mxu1 %v349_v0  ;;  %v39_v45 = vld [vmem:[%s622_s0 + $0xc8] sm:$0xff]  ;;  %v38_v47 = vld [vmem:[%s622_s0 + $0xc0] sm:$0xff]  ;;  %v25_v48 = vld [vmem:[%s622_s0 + $0x58] sm:$0xff] }
   0xe   :  { %v41_v49 = vld [vmem:[%s622_s0 + $0xd8] sm:$0xff]  ;;  %v24_v50 = vld [vmem:[%s622_s0 + $0x50] sm:$0xff]  ;;  %v27_v52 = vld [vmem:[%s622_s0 + $0x68] sm:$0xff] }
   0xf   :  { %v40_v51 = vld [vmem:[%s622_s0 + $0xd0] sm:$0xff]  ;;  %v43_v53 = vld [vmem:[%s622_s0 + $0xe8] sm:$0xff]  ;;  %v26_v54 = vld [vmem:[%s622_s0 + $0x60] sm:$0xff] }
  0x10   :  { %314 = vmatpush1.bf16.msra.mxu0 %v313_v14  ;;  %342 = vmatpush1.bf16.msra.mxu1 %v313_v14  ;;  %v42_v55 = vld [vmem:[%s622_s0 + $0xe0] sm:$0xff]  ;;  %v29_v56 = vld [vmem:[%s622_s0 + $0x78] sm:$0xff]  ;;  %v28_v58 = vld [vmem:[%s622_s0 + $0x70] sm:$0xff] }
  0x11   :  { %315 = vmatprep.subr.bf16.mxu0 %v349_v0  ;;  %334 = vmatprep.subr.bf16.mxu1 %v349_v0  ;;  %v45_v57 = vld [vmem:[%s622_s0 + $0xf8] sm:$0xff]  ;;  %v44_v59 = vld [vmem:[%s622_s0 + $0xf0] sm:$0xff]  ;;  %v286_v60 = vld [vmem:[%s623_s2] ss:$0 sm:$0xff] }
  0x14   :  { %317 = vmatpush1.bf16.msra.mxu0 %v316_v17  ;;  %343 = vmatpush1.bf16.msra.mxu1 %v316_v17 }
  0x15   :  { %318 = vmatprep.subr.bf16.mxu0 %v349_v0  ;;  %335 = vmatprep.subr.bf16.mxu1 %v349_v0 }
  0x18   :  { %320 = vmatpush1.bf16.msra.mxu0 %v319_v20  ;;  %344 = vmatpush1.bf16.msra.mxu1 %v319_v20 }
  0x19   :  { %321 = vmatprep.subr.bf16.mxu0 %v349_v0  ;;  %336 = vmatprep.subr.bf16.mxu1 %v349_v0 }
  0x1c   :  { %323 = vmatpush1.bf16.msra.mxu0 %v322_v23  ;;  %345 = vmatpush1.bf16.msra.mxu1 %v322_v23 }
  0x1d   :  { %324 = vmatprep.subr.bf16.mxu0 %v349_v0  ;;  %337 = vmatprep.subr.bf16.mxu1 %v349_v0 }
  0x20   :  { %326 = vmatpush1.bf16.msra.mxu0 %v325_v26  ;;  %346 = vmatpush1.bf16.msra.mxu1 %v325_v26 }
  0x21   :  { %327 = vmatprep.subr.bf16.mxu0 %v349_v0  ;;  %338 = vmatprep.subr.bf16.mxu1 %v349_v0 }
  0x24   :  { %329 = vmatpush1.bf16.msra.mxu0 %v328_v29  ;;  %347 = vmatpush1.bf16.msra.mxu1 %v328_v29 }
  0x27   :  { %185 = vmatmul.mubr.f32.vlgmr.msra.gmra.mrb[0].mxu0 %v14_v30  ;;  %225 = vmatmul.mubr.f32.vlgmr.msra.gmra.mrb[0].mxu1 %v30_v31 }
  0x28   :  { %288 = vmatprep.mubr.msk.f32.mxu0 %vm71_vm0, %v17_v32  ;;  %296 = vmatprep.mubr.msk.f32.mxu1 %vm71_vm0, %v33_v33 }
  0x2b   :  { %190 = vmatmul.mubr.f32.gmra.mrb[2].mxu0 %v16_v34  ;;  %230 = vmatmul.mubr.f32.gmra.mrb[2].mxu1 %v32_v35 }
  0x2c   :  { %289 = vmatprep.mubr.msk.f32.mxu0 %vm71_vm0, %v19_v36  ;;  %297 = vmatprep.mubr.msk.f32.mxu1 %vm71_vm0, %v35_v37 }
  0x2f   :  { %195 = vmatmul.mubr.f32.gmra.mrb[4].mxu0 %v18_v38  ;;  %235 = vmatmul.mubr.f32.gmra.mrb[4].mxu1 %v34_v39 }
  0x30   :  { %290 = vmatprep.mubr.msk.f32.mxu0 %vm71_vm0, %v21_v40  ;;  %298 = vmatprep.mubr.msk.f32.mxu1 %vm71_vm0, %v37_v41 }
  0x33   :  { %200 = vmatmul.mubr.f32.gmra.mrb[6].mxu0 %v20_v42  ;;  %240 = vmatmul.mubr.f32.gmra.mrb[6].mxu1 %v36_v43 }
  0x34   :  { %291 = vmatprep.mubr.msk.f32.mxu0 %vm71_vm0, %v23_v44  ;;  %299 = vmatprep.mubr.msk.f32.mxu1 %vm71_vm0, %v39_v45 }
  0x37   :  { %205 = vmatmul.mubr.f32.gmra.mrb[8].mxu0 %v22_v46  ;;  %245 = vmatmul.mubr.f32.gmra.mrb[8].mxu1 %v38_v47 }
  0x38   :  { %292 = vmatprep.mubr.msk.f32.mxu0 %vm71_vm0, %v25_v48  ;;  %300 = vmatprep.mubr.msk.f32.mxu1 %vm71_vm0, %v41_v49 }
  0x3b   :  { %210 = vmatmul.mubr.f32.gmra.mrb[10].mxu0 %v24_v50  ;;  %250 = vmatmul.mubr.f32.gmra.mrb[10].mxu1 %v40_v51 }
  0x3c   :  { %293 = vmatprep.mubr.msk.f32.mxu0 %vm71_vm0, %v27_v52  ;;  %301 = vmatprep.mubr.msk.f32.mxu1 %vm71_vm0, %v43_v53 }
  0x3f   :  { %215 = vmatmul.mubr.f32.gmra.mrb[12].mxu0 %v26_v54  ;;  %255 = vmatmul.mubr.f32.gmra.mrb[12].mxu1 %v42_v55 }
  0x40   :  { %294 = vmatprep.mubr.msk.f32.mxu0 %vm71_vm0, %v29_v56  ;;  %302 = vmatprep.mubr.msk.f32.mxu1 %vm71_vm0, %v45_v57 }
  0x43   :  { %220 = vmatmul.mubr.f32.gmra.mrb[14].mxu0 %v28_v58  ;;  %260 = vmatmul.mubr.f32.gmra.mrb[14].mxu1 %v44_v59 }
  0xfa   :  { %v186_v61 = vpop.f32.mrb[0].mxu0  ;;  %v226_v62 = vpop.f32.mrb[0].mxu1 }
  0xfb   :  { %v187_v63 = vadd.f32 %v286_v60, %v186_v61  ;;  %v227_v0 = vadd.f32 %v286_v60, %v226_v62  ;;  %v188_v1 = vpop.f32.mrb[1].mxu0  ;;  %v228_v2 = vpop.f32.mrb[1].mxu1 }
  0xfd   :  { %266 = vst.msk [vmem:[%s624_s3] sm:$0xff] %vm265_vm1, %v187_v63  ;;  %274 = vst.msk [vmem:[%s624_s3 + $0x40] sm:$0xff] %vm265_vm1, %v227_v0 }
  0xfe   :  { %v191_v3 = vpop.f32.mrb[2].mxu0  ;;  %v231_v4 = vpop.f32.mrb[2].mxu1 }
  0xff   :  { %v192_v5 = vadd.f32 %v286_v60, %v191_v3  ;;  %v232_v6 = vadd.f32 %v286_v60, %v231_v4  ;;  %v193_v7 = vpop.f32.mrb[3].mxu0  ;;  %v233_v8 = vpop.f32.mrb[3].mxu1 }
 0x101   :  { %267 = vst.msk [vmem:[%s624_s3 + $0x8] sm:$0xff] %vm265_vm1, %v192_v5  ;;  %275 = vst.msk [vmem:[%s624_s3 + $0x48] sm:$0xff] %vm265_vm1, %v232_v6 }
 0x102   :  { %v196_v9 = vpop.f32.mrb[4].mxu0  ;;  %v236_v10 = vpop.f32.mrb[4].mxu1 }
 0x103   :  { %v197_v11 = vadd.f32 %v286_v60, %v196_v9  ;;  %v237_v12 = vadd.f32 %v286_v60, %v236_v10  ;;  %v198_v13 = vpop.f32.mrb[5].mxu0  ;;  %v238_v14 = vpop.f32.mrb[5].mxu1 }
 0x105   :  { %268 = vst.msk [vmem:[%s624_s3 + $0x10] sm:$0xff] %vm265_vm1, %v197_v11  ;;  %276 = vst.msk [vmem:[%s624_s3 + $0x50] sm:$0xff] %vm265_vm1, %v237_v12 }
 0x106   :  { %v201_v15 = vpop.f32.mrb[6].mxu0  ;;  %v241_v16 = vpop.f32.mrb[6].mxu1 }
 0x107   :  { %v202_v17 = vadd.f32 %v286_v60, %v201_v15  ;;  %v242_v18 = vadd.f32 %v286_v60, %v241_v16  ;;  %v203_v19 = vpop.f32.mrb[7].mxu0  ;;  %v243_v20 = vpop.f32.mrb[7].mxu1 }
 0x109   :  { %269 = vst.msk [vmem:[%s624_s3 + $0x18] sm:$0xff] %vm265_vm1, %v202_v17  ;;  %277 = vst.msk [vmem:[%s624_s3 + $0x58] sm:$0xff] %vm265_vm1, %v242_v18 }
 0x10a   :  { %v206_v21 = vpop.f32.mrb[8].mxu0  ;;  %v246_v22 = vpop.f32.mrb[8].mxu1 }
 0x10b   :  { %v207_v23 = vadd.f32 %v286_v60, %v206_v21  ;;  %v247_v24 = vadd.f32 %v286_v60, %v246_v22  ;;  %v208_v25 = vpop.f32.mrb[9].mxu0  ;;  %v248_v26 = vpop.f32.mrb[9].mxu1 }
 0x10d   :  { %270 = vst.msk [vmem:[%s624_s3 + $0x20] sm:$0xff] %vm265_vm1, %v207_v23  ;;  %278 = vst.msk [vmem:[%s624_s3 + $0x60] sm:$0xff] %vm265_vm1, %v247_v24 }
 0x10e   :  { %v211_v27 = vpop.f32.mrb[10].mxu0  ;;  %v251_v28 = vpop.f32.mrb[10].mxu1 }
 0x10f   :  { %v212_v29 = vadd.f32 %v286_v60, %v211_v27  ;;  %v252_v30 = vadd.f32 %v286_v60, %v251_v28  ;;  %v213_v31 = vpop.f32.mrb[11].mxu0  ;;  %v253_v32 = vpop.f32.mrb[11].mxu1 }
 0x111   :  { %271 = vst.msk [vmem:[%s624_s3 + $0x28] sm:$0xff] %vm265_vm1, %v212_v29  ;;  %279 = vst.msk [vmem:[%s624_s3 + $0x68] sm:$0xff] %vm265_vm1, %v252_v30 }
 0x112   :  { %v216_v33 = vpop.f32.mrb[12].mxu0  ;;  %v256_v34 = vpop.f32.mrb[12].mxu1 }
 0x113   :  { %v217_v35 = vadd.f32 %v286_v60, %v216_v33  ;;  %v257_v36 = vadd.f32 %v286_v60, %v256_v34  ;;  %v218_v37 = vpop.f32.mrb[13].mxu0  ;;  %v258_v38 = vpop.f32.mrb[13].mxu1 }
 0x115   :  { %272 = vst.msk [vmem:[%s624_s3 + $0x30] sm:$0xff] %vm265_vm1, %v217_v35  ;;  %280 = vst.msk [vmem:[%s624_s3 + $0x70] sm:$0xff] %vm265_vm1, %v257_v36 }
 0x116   :  { %v221_v39 = vpop.f32.mrb[14].mxu0  ;;  %v261_v40 = vpop.f32.mrb[14].mxu1 }
 0x117   :  { %v222_v41 = vadd.f32 %v286_v60, %v221_v39  ;;  %v262_v42 = vadd.f32 %v286_v60, %v261_v40  ;;  %v223_v43 = vpop.f32.mrb[15].mxu0  ;;  %v263_v44 = vpop.f32.mrb[15].mxu1 }
 0x119   :  { %273 = vst.msk [vmem:[%s624_s3 + $0x38] sm:$0xff] %vm265_vm1, %v222_v41  ;;  %281 = vst.msk [vmem:[%s624_s3 + $0x78] sm:$0xff] %vm265_vm1, %v262_v42 }

</bundles_post_ra>
